<compile_context>
chip_gen: v7x
topology: tpu7x:2x2x1
jax: 0.10.0
libtpu: 0.0.40
codegen_flags: <defaults>
</compile_context>

<pallas_src>
import functools

import jax
import jax.numpy as jnp
from jax.experimental import pallas as pl
from jax.experimental.pallas import tpu as pltpu


# ---------------- model hyperparameters (match the PyTorch module) -----------
N_FEATS = 64                      # default n_feats in simple_denoise
H = 4 * N_FEATS                   # hidden width n_featsx4 = 256
N_DENOISE_RES = 5                 # number of ResMLP blocks
TIMESTEPS = 5
MAX_PERIOD = TIMESTEPS * 10       # 50
D_IN = 2 * H + 1                  # concat([c, t, x]) feature dim = 513
NEG_SLOPE = 0.1                   # LeakyReLU(0.1)


def _leaky_relu(x, slope=NEG_SLOPE):
    return jnp.where(x > 0, x, slope * x)


def _round_up(x, m):
    return ((x + m - 1) // m) * m


# ---------------------------- Pallas kernel ----------------------------------
def denoise_mlp_kernel(c_ref, x_ref, t_ref, wc_ref, wx_ref, wt_ref, b0_ref,
                       ws_ref, bs_ref, o_ref, *, n_sub):
    """One row tile of the full MLP chain.

    c_ref : (tm, H)  bf16    conditioning rows
    x_ref : (tm, H)  bf16    noisy-feature rows
    t_ref : (tm, 1)  f32     normalized timestep (t / max_period)
    wc_ref: (H, H)   bf16    first-Linear weight rows acting on c
    wx_ref: (H, H)   bf16    first-Linear weight rows acting on x
    wt_ref: (1, H)   f32     first-Linear weight row acting on t
    b0_ref: (1, H)   f32     first-Linear bias
    ws_ref: (N_RES, H, H) bf16  stacked ResMLP Linear weights
    bs_ref: (N_RES, 1, H) f32   stacked ResMLP Linear biases
    o_ref : (tm, H)  f32     output tile

    The hidden lives as a traced bf16 value between layers.  The tile is split
    into `n_sub` independent row sub-tiles so one sub-tile's epilogue
    (bias + LeakyReLU + cast) can overlap another sub-tile's matmul.
    """
    tm = o_ref.shape[0]
    sub = tm // n_sub

    # --- first Linear, split-K: two K=256 MXU contractions + rank-1 t term ---
    hs = []
    for s in range(n_sub):
        rows = pl.ds(s * sub, sub)
        h = jnp.dot(c_ref[rows, :], wc_ref[...],
                    preferred_element_type=jnp.float32)
        h = h + jnp.dot(x_ref[rows, :], wx_ref[...],
                        preferred_element_type=jnp.float32)
        h = h + t_ref[rows, :] * wt_ref[...] + b0_ref[...]
        hs.append(_leaky_relu(h).astype(jnp.bfloat16))

    # --- n_denoise_res sequential Linear + LeakyReLU blocks (no residual) ----
    for i in range(N_DENOISE_RES):
        last = i == N_DENOISE_RES - 1
        nxt = []
        for s in range(n_sub):
            a = jnp.dot(hs[s], ws_ref[i], preferred_element_type=jnp.float32)
            a = _leaky_relu(a + bs_ref[i])
            if last:
                o_ref[pl.ds(s * sub, sub), :] = a          # final layer -> f32
            else:
                nxt.append(a.astype(jnp.bfloat16))         # fused relu + cast
        hs = nxt


# ------------------------------- wrapper --------------------------------------
def _choose_row_tiling(M, tm_max=1024):
    """Adaptive (row_tile, n_tiles).

    Small M: one tile padded only to the 16-row bf16 packing granule (avoids
    pushing ~256 mostly-padded rows through 7 matmuls for tiny batches).
    Large M: >=2 tiles so the 'parallel' grid axis shards across both v7x
    TensorCores; each tile a multiple of 128 rows, capped at tm_max (per-step
    overhead ~0.35us amortized, total VMEM stays well under every gen's limit).
    """
    if M <= 256:
        return _round_up(max(M, 1), 16), 1
    tm = min(tm_max, _round_up((M + 1) // 2, 128))
    return tm, -(-M // tm)


def simple_denoise_pallas(x, c, t, params, *, tm_max=1024):
    """Forward of simple_denoise.

    x: (b, n, H) float32
    c: (b, n, H) float32
    t: (b, n)    int or float timestep
    params: dict with w0 (D_IN,H), b0 (H,), ws (N_RES,H,H), bs (N_RES,H)
            (w0 rows ordered like the torch concat: [c | t | x])
    returns: (b, n, H) float32
    """
    b, n, h_dim = x.shape
    assert h_dim == H
    M = b * n
    tm, n_tiles = _choose_row_tiling(M, tm_max)
    M_pad = tm * n_tiles
    n_sub = 2 if (tm % 256 == 0) else 1        # half-row interleave for big tiles

    # --- glue: normalize t, flatten rows, pad rows up to the tile multiple ---
    t_f = (t.astype(jnp.float32) / MAX_PERIOD).reshape(M, 1)
    c2d = c.reshape(M, H).astype(jnp.bfloat16)
    x2d = x.reshape(M, H).astype(jnp.bfloat16)
    if M_pad != M:
        pad = M_pad - M
        c2d = jnp.pad(c2d, ((0, pad), (0, 0)))
        x2d = jnp.pad(x2d, ((0, pad), (0, 0)))
        t_f = jnp.pad(t_f, ((0, pad), (0, 0)))

    # --- split the first Linear weight: rows [0:H]->c, [H]->t, [H+1:]->x -----
    w0 = params["w0"].astype(jnp.float32)                  # (D_IN, H)
    wc = w0[:H, :].astype(jnp.bfloat16)                    # (H, H)
    wt = w0[H:H + 1, :]                                    # (1, H) f32
    wx = w0[H + 1:, :].astype(jnp.bfloat16)                # (H, H)
    b0 = params["b0"].reshape(1, H).astype(jnp.float32)
    ws = params["ws"].astype(jnp.bfloat16)                 # (N_RES, H, H)
    bs = params["bs"].reshape(N_DENOISE_RES, 1, H).astype(jnp.float32)

    flops = 2 * M_pad * H * H * (2 + N_DENOISE_RES) + 8 * M_pad * H
    bytes_accessed = (
        2 * M_pad * H * 2                    # c, x tiles (bf16)
        + 4 * M_pad                          # t
        + (2 + N_DENOISE_RES) * H * H * 2    # bf16 weights
        + (2 + N_DENOISE_RES) * H * 4        # biases + w_t row
        + M_pad * H * 4                      # output (f32)
    )

    kernel = functools.partial(denoise_mlp_kernel, n_sub=n_sub)
    out2d = pl.pallas_call(
        kernel,
        out_shape=jax.ShapeDtypeStruct((M_pad, H), jnp.float32),
        grid_spec=pltpu.PrefetchScalarGridSpec(
            num_scalar_prefetch=0,
            grid=(n_tiles,),
            in_specs=[
                pl.BlockSpec((tm, H), lambda i: (i, 0)),                    # c rows
                pl.BlockSpec((tm, H), lambda i: (i, 0)),                    # x rows
                pl.BlockSpec((tm, 1), lambda i: (i, 0)),                    # t rows
                pl.BlockSpec((H, H), lambda i: (0, 0)),                     # W_c
                pl.BlockSpec((H, H), lambda i: (0, 0)),                     # W_x
                pl.BlockSpec((1, H), lambda i: (0, 0)),                     # w_t
                pl.BlockSpec((1, H), lambda i: (0, 0)),                     # b0
                pl.BlockSpec((N_DENOISE_RES, H, H), lambda i: (0, 0, 0)),   # ws
                pl.BlockSpec((N_DENOISE_RES, 1, H), lambda i: (0, 0, 0)),   # bs
            ],
            out_specs=pl.BlockSpec((tm, H), lambda i: (i, 0)),
        ),
        compiler_params=pltpu.CompilerParams(
            dimension_semantics=("parallel",),
        ),
        cost_estimate=pl.CostEstimate(
            flops=flops, transcendentals=0, bytes_accessed=bytes_accessed),
    )(c2d, x2d, t_f, wc, wx, wt, b0, ws, bs)

    return out2d[:M].reshape(b, n, H)


# ------------------------------ references -----------------------------------
def simple_denoise_ref_f32(x, c, t, params):
    """Pure f32 reference (mirrors the torch module exactly)."""
    b, n, _ = x.shape
    t_f = (t.astype(jnp.float32) / MAX_PERIOD).reshape(b, n, 1)
    h = jnp.concatenate([c, t_f, x], axis=-1)
    h = _leaky_relu(h @ params["w0"] + params["b0"])
    for i in range(N_DENOISE_RES):
        h = _leaky_relu(h @ params["ws"][i] + params["bs"][i])
    return h


def simple_denoise_ref_bf16(x, c, t, params):
    """Precision-matched reference (bf16 MXU inputs/hidden, f32 accumulation)."""
    b, n, _ = x.shape
    M = b * n
    t_f = (t.astype(jnp.float32) / MAX_PERIOD).reshape(M, 1)
    c2d = c.reshape(M, H).astype(jnp.bfloat16)
    x2d = x.reshape(M, H).astype(jnp.bfloat16)
    w0 = params["w0"].astype(jnp.float32)
    wc = w0[:H, :].astype(jnp.bfloat16)
    wt = w0[H:H + 1, :]
    wx = w0[H + 1:, :].astype(jnp.bfloat16)
    h = jnp.dot(c2d, wc, preferred_element_type=jnp.float32)
    h = h + jnp.dot(x2d, wx, preferred_element_type=jnp.float32)
    h = h + t_f * wt + params["b0"].reshape(1, H)
    h = _leaky_relu(h)
    for i in range(N_DENOISE_RES):
        hb = h.astype(jnp.bfloat16)
        h = jnp.dot(hb, params["ws"][i].astype(jnp.bfloat16),
                    preferred_element_type=jnp.float32)
        h = _leaky_relu(h + params["bs"][i].reshape(1, H))
    return h.reshape(b, n, H)


# ------------------------------ setup / main ----------------------------------
def init_params(key):
    """Deterministic synthetic weights (shapes match the nn.Linear layers)."""
    k0, k1, k2, k3 = jax.random.split(key, 4)
    # nn.Linear stores weight as (out, in); we keep them as (in, out) = W.T here.
    w0 = jax.random.normal(k0, (D_IN, H), jnp.float32) * (1.0 / jnp.sqrt(D_IN))
    b0 = jax.random.normal(k1, (H,), jnp.float32) * 0.01
    ws = jax.random.normal(k2, (N_DENOISE_RES, H, H), jnp.float32) * (1.0 / jnp.sqrt(H))
    bs = jax.random.normal(k3, (N_DENOISE_RES, H), jnp.float32) * 0.01
    return {"w0": w0, "b0": b0, "ws": ws, "bs": bs}


def _run_case(b, n, params, kx, kc, kt):
    x = jax.random.normal(kx, (b, n, H), jnp.float32)
    c = jax.random.normal(kc, (b, n, H), jnp.float32)
    t = jax.random.randint(kt, (b, n), 0, TIMESTEPS).astype(jnp.int32)

    out = jax.block_until_ready(simple_denoise_pallas(x, c, t, params))
    assert out.shape == (b, n, H)

    # Tight check vs a reference using the same mixed-precision recipe.
    ref_b = simple_denoise_ref_bf16(x, c, t, params)
    assert jnp.allclose(out, ref_b, atol=2e-3, rtol=2e-3), \
        f"mismatch vs precision-matched reference (b={b}, n={n})"
    # Looser semantic check vs the full-f32 torch-equivalent forward.
    ref_f = simple_denoise_ref_f32(x, c, t, params)
    assert jnp.allclose(out, ref_f, atol=1e-1, rtol=1e-1), \
        f"mismatch vs f32 reference (b={b}, n={n})"


if __name__ == "__main__":
    keys = jax.random.split(jax.random.PRNGKey(0), 7)
    params = init_params(keys[0])

    # Small case: M=16 -> single 16-row tile (adaptive padding, no 256-row waste).
    _run_case(2, 8, params, keys[1], keys[2], keys[3])
    # Larger case: M=1024 -> two 512-row tiles (megacore-parallel grid),
    # each processed as two interleaved 256-row sub-tiles.
    _run_case(4, 256, params, keys[4], keys[5], keys[6])

    print("KERNEL_OK")
</pallas_src>

<mosaic_0001>
module attributes {stable_mosaic.version = 11 : i64} {
  func.func @denoise_mlp_kernel(%arg0: i32, %arg1: memref<16x256xbf16, #tpu.memory_space<vmem>>, %arg2: memref<16x256xbf16, #tpu.memory_space<vmem>>, %arg3: memref<16x1xf32, #tpu.memory_space<vmem>>, %arg4: memref<256x256xbf16, #tpu.memory_space<vmem>>, %arg5: memref<256x256xbf16, #tpu.memory_space<vmem>>, %arg6: memref<1x256xf32, #tpu.memory_space<vmem>>, %arg7: memref<1x256xf32, #tpu.memory_space<vmem>>, %arg8: memref<5x256x256xbf16, #tpu.memory_space<vmem>>, %arg9: memref<5x1x256xf32, #tpu.memory_space<vmem>>, %arg10: memref<16x256xf32, #tpu.memory_space<vmem>>) attributes {dimension_semantics = [#tpu.dimension_semantics<parallel>], iteration_bounds = array<i64: 1>, scalar_prefetch = 0 : i64, scratch_operands = 0 : i64, tpu.core_type = #tpu.core_type<tc>, window_params = [{transform_indices = @transform_0, window_bounds = array<i64: 16, 256>}, {transform_indices = @transform_1, window_bounds = array<i64: 16, 256>}, {transform_indices = @transform_2, window_bounds = array<i64: 16, 1>}, {pipeline_mode = #tpu.pipeline_mode<synchronous>, transform_indices = @transform_3, window_bounds = array<i64: 256, 256>}, {pipeline_mode = #tpu.pipeline_mode<synchronous>, transform_indices = @transform_4, window_bounds = array<i64: 256, 256>}, {pipeline_mode = #tpu.pipeline_mode<synchronous>, transform_indices = @transform_5, window_bounds = array<i64: 1, 256>}, {pipeline_mode = #tpu.pipeline_mode<synchronous>, transform_indices = @transform_6, window_bounds = array<i64: 1, 256>}, {pipeline_mode = #tpu.pipeline_mode<synchronous>, transform_indices = @transform_7, window_bounds = array<i64: 5, 256, 256>}, {pipeline_mode = #tpu.pipeline_mode<synchronous>, transform_indices = @transform_8, window_bounds = array<i64: 5, 1, 256>}, {transform_indices = @transform_9, window_bounds = array<i64: 16, 256>}]} {
    %c0 = arith.constant 0 : index
    %c0_0 = arith.constant 0 : index
    %0 = vector.load %arg1[%c0, %c0_0] : memref<16x256xbf16, #tpu.memory_space<vmem>>, vector<16x256xbf16>
    %c0_1 = arith.constant 0 : index
    %c0_2 = arith.constant 0 : index
    %1 = vector.load %arg4[%c0_1, %c0_2] : memref<256x256xbf16, #tpu.memory_space<vmem>>, vector<256x256xbf16>
    %cst = arith.constant dense<0.000000e+00> : vector<16x256xf32>
    %2 = tpu.matmul %0, %1, %cst {dimension_numbers = #tpu.dot_dimension_numbers<[1], [0], [0], [1], [0, 0, 1, 1], [], []>} : vector<16x256xbf16>, vector<256x256xbf16>, vector<16x256xf32> -> vector<16x256xf32>
    %c0_3 = arith.constant 0 : index
    %c0_4 = arith.constant 0 : index
    %3 = vector.load %arg2[%c0_3, %c0_4] : memref<16x256xbf16, #tpu.memory_space<vmem>>, vector<16x256xbf16>
    %c0_5 = arith.constant 0 : index
    %c0_6 = arith.constant 0 : index
    %4 = vector.load %arg5[%c0_5, %c0_6] : memref<256x256xbf16, #tpu.memory_space<vmem>>, vector<256x256xbf16>
    %cst_7 = arith.constant dense<0.000000e+00> : vector<16x256xf32>
    %5 = tpu.matmul %3, %4, %cst_7 {dimension_numbers = #tpu.dot_dimension_numbers<[1], [0], [0], [1], [0, 0, 1, 1], [], []>} : vector<16x256xbf16>, vector<256x256xbf16>, vector<16x256xf32> -> vector<16x256xf32>
    %6 = arith.addf %2, %5 : vector<16x256xf32>
    %c0_8 = arith.constant 0 : index
    %c0_9 = arith.constant 0 : index
    %7 = vector.load %arg3[%c0_8, %c0_9] : memref<16x1xf32, #tpu.memory_space<vmem>>, vector<16x1xf32>
    %c0_10 = arith.constant 0 : index
    %c0_11 = arith.constant 0 : index
    %8 = vector.load %arg6[%c0_10, %c0_11] : memref<1x256xf32, #tpu.memory_space<vmem>>, vector<1x256xf32>
    %9 = vector.broadcast %7 : vector<16x1xf32> to vector<16x256xf32>
    %10 = vector.broadcast %8 : vector<1x256xf32> to vector<16x256xf32>
    %11 = arith.mulf %9, %10 : vector<16x256xf32>
    %12 = arith.addf %6, %11 : vector<16x256xf32>
    %c0_12 = arith.constant 0 : index
    %c0_13 = arith.constant 0 : index
    %13 = vector.load %arg7[%c0_12, %c0_13] : memref<1x256xf32, #tpu.memory_space<vmem>>, vector<1x256xf32>
    %14 = vector.broadcast %13 : vector<1x256xf32> to vector<16x256xf32>
    %15 = arith.addf %12, %14 : vector<16x256xf32>
    %cst_14 = arith.constant 0.000000e+00 : f32
    %16 = vector.broadcast %cst_14 : f32 to vector<16x256xf32>
    %17 = arith.cmpf ogt, %15, %16 : vector<16x256xf32>
    %cst_15 = arith.constant 1.000000e-01 : f32
    %18 = vector.broadcast %cst_15 : f32 to vector<16x256xf32>
    %19 = arith.mulf %18, %15 : vector<16x256xf32>
    %20 = arith.select %17, %15, %19 : vector<16x256xi1>, vector<16x256xf32>
    %21 = arith.truncf %20 : vector<16x256xf32> to vector<16x256xbf16>
    %c0_16 = arith.constant 0 : index
    %c0_17 = arith.constant 0 : index
    %c0_18 = arith.constant 0 : index
    %22 = vector.load %arg8[%c0_16, %c0_17, %c0_18] : memref<5x256x256xbf16, #tpu.memory_space<vmem>>, vector<1x256x256xbf16>
    %23 = vector.shape_cast %22 : vector<1x256x256xbf16> to vector<256x256xbf16>
    %cst_19 = arith.constant dense<0.000000e+00> : vector<16x256xf32>
    %24 = tpu.matmul %21, %23, %cst_19 {dimension_numbers = #tpu.dot_dimension_numbers<[1], [0], [0], [1], [0, 0, 1, 1], [], []>} : vector<16x256xbf16>, vector<256x256xbf16>, vector<16x256xf32> -> vector<16x256xf32>
    %c0_20 = arith.constant 0 : index
    %c0_21 = arith.constant 0 : index
    %c0_22 = arith.constant 0 : index
    %25 = vector.load %arg9[%c0_20, %c0_21, %c0_22] : memref<5x1x256xf32, #tpu.memory_space<vmem>>, vector<1x1x256xf32>
    %26 = vector.shape_cast %25 : vector<1x1x256xf32> to vector<1x256xf32>
    %27 = vector.broadcast %26 : vector<1x256xf32> to vector<16x256xf32>
    %28 = arith.addf %24, %27 : vector<16x256xf32>
    %cst_23 = arith.constant 0.000000e+00 : f32
    %29 = vector.broadcast %cst_23 : f32 to vector<16x256xf32>
    %30 = arith.cmpf ogt, %28, %29 : vector<16x256xf32>
    %cst_24 = arith.constant 1.000000e-01 : f32
    %31 = vector.broadcast %cst_24 : f32 to vector<16x256xf32>
    %32 = arith.mulf %31, %28 : vector<16x256xf32>
    %33 = arith.select %30, %28, %32 : vector<16x256xi1>, vector<16x256xf32>
    %34 = arith.truncf %33 : vector<16x256xf32> to vector<16x256xbf16>
    %c1 = arith.constant 1 : index
    %c0_25 = arith.constant 0 : index
    %c0_26 = arith.constant 0 : index
    %35 = vector.load %arg8[%c1, %c0_25, %c0_26] : memref<5x256x256xbf16, #tpu.memory_space<vmem>>, vector<1x256x256xbf16>
    %36 = vector.shape_cast %35 : vector<1x256x256xbf16> to vector<256x256xbf16>
    %cst_27 = arith.constant dense<0.000000e+00> : vector<16x256xf32>
    %37 = tpu.matmul %34, %36, %cst_27 {dimension_numbers = #tpu.dot_dimension_numbers<[1], [0], [0], [1], [0, 0, 1, 1], [], []>} : vector<16x256xbf16>, vector<256x256xbf16>, vector<16x256xf32> -> vector<16x256xf32>
    %c1_28 = arith.constant 1 : index
    %c0_29 = arith.constant 0 : index
    %c0_30 = arith.constant 0 : index
    %38 = vector.load %arg9[%c1_28, %c0_29, %c0_30] : memref<5x1x256xf32, #tpu.memory_space<vmem>>, vector<1x1x256xf32>
    %39 = vector.shape_cast %38 : vector<1x1x256xf32> to vector<1x256xf32>
    %40 = vector.broadcast %39 : vector<1x256xf32> to vector<16x256xf32>
    %41 = arith.addf %37, %40 : vector<16x256xf32>
    %cst_31 = arith.constant 0.000000e+00 : f32
    %42 = vector.broadcast %cst_31 : f32 to vector<16x256xf32>
    %43 = arith.cmpf ogt, %41, %42 : vector<16x256xf32>
    %cst_32 = arith.constant 1.000000e-01 : f32
    %44 = vector.broadcast %cst_32 : f32 to vector<16x256xf32>
    %45 = arith.mulf %44, %41 : vector<16x256xf32>
    %46 = arith.select %43, %41, %45 : vector<16x256xi1>, vector<16x256xf32>
    %47 = arith.truncf %46 : vector<16x256xf32> to vector<16x256xbf16>
    %c2 = arith.constant 2 : index
    %c0_33 = arith.constant 0 : index
    %c0_34 = arith.constant 0 : index
    %48 = vector.load %arg8[%c2, %c0_33, %c0_34] : memref<5x256x256xbf16, #tpu.memory_space<vmem>>, vector<1x256x256xbf16>
    %49 = vector.shape_cast %48 : vector<1x256x256xbf16> to vector<256x256xbf16>
    %cst_35 = arith.constant dense<0.000000e+00> : vector<16x256xf32>
    %50 = tpu.matmul %47, %49, %cst_35 {dimension_numbers = #tpu.dot_dimension_numbers<[1], [0], [0], [1], [0, 0, 1, 1], [], []>} : vector<16x256xbf16>, vector<256x256xbf16>, vector<16x256xf32> -> vector<16x256xf32>
    %c2_36 = arith.constant 2 : index
    %c0_37 = arith.constant 0 : index
    %c0_38 = arith.constant 0 : index
    %51 = vector.load %arg9[%c2_36, %c0_37, %c0_38] : memref<5x1x256xf32, #tpu.memory_space<vmem>>, vector<1x1x256xf32>
    %52 = vector.shape_cast %51 : vector<1x1x256xf32> to vector<1x256xf32>
    %53 = vector.broadcast %52 : vector<1x256xf32> to vector<16x256xf32>
    %54 = arith.addf %50, %53 : vector<16x256xf32>
    %cst_39 = arith.constant 0.000000e+00 : f32
    %55 = vector.broadcast %cst_39 : f32 to vector<16x256xf32>
    %56 = arith.cmpf ogt, %54, %55 : vector<16x256xf32>
    %cst_40 = arith.constant 1.000000e-01 : f32
    %57 = vector.broadcast %cst_40 : f32 to vector<16x256xf32>
    %58 = arith.mulf %57, %54 : vector<16x256xf32>
    %59 = arith.select %56, %54, %58 : vector<16x256xi1>, vector<16x256xf32>
    %60 = arith.truncf %59 : vector<16x256xf32> to vector<16x256xbf16>
    %c3 = arith.constant 3 : index
    %c0_41 = arith.constant 0 : index
    %c0_42 = arith.constant 0 : index
    %61 = vector.load %arg8[%c3, %c0_41, %c0_42] : memref<5x256x256xbf16, #tpu.memory_space<vmem>>, vector<1x256x256xbf16>
    %62 = vector.shape_cast %61 : vector<1x256x256xbf16> to vector<256x256xbf16>
    %cst_43 = arith.constant dense<0.000000e+00> : vector<16x256xf32>
    %63 = tpu.matmul %60, %62, %cst_43 {dimension_numbers = #tpu.dot_dimension_numbers<[1], [0], [0], [1], [0, 0, 1, 1], [], []>} : vector<16x256xbf16>, vector<256x256xbf16>, vector<16x256xf32> -> vector<16x256xf32>
    %c3_44 = arith.constant 3 : index
    %c0_45 = arith.constant 0 : index
    %c0_46 = arith.constant 0 : index
    %64 = vector.load %arg9[%c3_44, %c0_45, %c0_46] : memref<5x1x256xf32, #tpu.memory_space<vmem>>, vector<1x1x256xf32>
    %65 = vector.shape_cast %64 : vector<1x1x256xf32> to vector<1x256xf32>
    %66 = vector.broadcast %65 : vector<1x256xf32> to vector<16x256xf32>
    %67 = arith.addf %63, %66 : vector<16x256xf32>
    %cst_47 = arith.constant 0.000000e+00 : f32
    %68 = vector.broadcast %cst_47 : f32 to vector<16x256xf32>
    %69 = arith.cmpf ogt, %67, %68 : vector<16x256xf32>
    %cst_48 = arith.constant 1.000000e-01 : f32
    %70 = vector.broadcast %cst_48 : f32 to vector<16x256xf32>
    %71 = arith.mulf %70, %67 : vector<16x256xf32>
    %72 = arith.select %69, %67, %71 : vector<16x256xi1>, vector<16x256xf32>
    %73 = arith.truncf %72 : vector<16x256xf32> to vector<16x256xbf16>
    %c4 = arith.constant 4 : index
    %c0_49 = arith.constant 0 : index
    %c0_50 = arith.constant 0 : index
    %74 = vector.load %arg8[%c4, %c0_49, %c0_50] : memref<5x256x256xbf16, #tpu.memory_space<vmem>>, vector<1x256x256xbf16>
    %75 = vector.shape_cast %74 : vector<1x256x256xbf16> to vector<256x256xbf16>
    %cst_51 = arith.constant dense<0.000000e+00> : vector<16x256xf32>
    %76 = tpu.matmul %73, %75, %cst_51 {dimension_numbers = #tpu.dot_dimension_numbers<[1], [0], [0], [1], [0, 0, 1, 1], [], []>} : vector<16x256xbf16>, vector<256x256xbf16>, vector<16x256xf32> -> vector<16x256xf32>
    %c4_52 = arith.constant 4 : index
    %c0_53 = arith.constant 0 : index
    %c0_54 = arith.constant 0 : index
    %77 = vector.load %arg9[%c4_52, %c0_53, %c0_54] : memref<5x1x256xf32, #tpu.memory_space<vmem>>, vector<1x1x256xf32>
    %78 = vector.shape_cast %77 : vector<1x1x256xf32> to vector<1x256xf32>
    %79 = vector.broadcast %78 : vector<1x256xf32> to vector<16x256xf32>
    %80 = arith.addf %76, %79 : vector<16x256xf32>
    %cst_55 = arith.constant 0.000000e+00 : f32
    %81 = vector.broadcast %cst_55 : f32 to vector<16x256xf32>
    %82 = arith.cmpf ogt, %80, %81 : vector<16x256xf32>
    %cst_56 = arith.constant 1.000000e-01 : f32
    %83 = vector.broadcast %cst_56 : f32 to vector<16x256xf32>
    %84 = arith.mulf %83, %80 : vector<16x256xf32>
    %85 = arith.select %82, %80, %84 : vector<16x256xi1>, vector<16x256xf32>
    %c0_57 = arith.constant 0 : index
    %c0_58 = arith.constant 0 : index
    %86 = vector.load %arg10[%c0_57, %c0_58] : memref<16x256xf32, #tpu.memory_space<vmem>>, vector<16x256xf32>
    tpu.vector_store %arg10[%c0_57, %c0_58], %85 {strides = array<i32>} : memref<16x256xf32, #tpu.memory_space<vmem>>, vector<16x256xf32>,
    return
  }
  func.func @transform_0(%arg0: i32) -> (i32, i32) {
    %c0_i32 = arith.constant 0 : i32
    %c0_i32_0 = arith.constant 0 : i32
    return %arg0, %c0_i32 : i32, i32
  }
  func.func @transform_1(%arg0: i32) -> (i32, i32) {
    %c0_i32 = arith.constant 0 : i32
    %c0_i32_0 = arith.constant 0 : i32
    return %arg0, %c0_i32 : i32, i32
  }
  func.func @transform_2(%arg0: i32) -> (i32, i32) {
    %c0_i32 = arith.constant 0 : i32
    %c0_i32_0 = arith.constant 0 : i32
    return %arg0, %c0_i32 : i32, i32
  }
  func.func @transform_3(%arg0: i32) -> (i32, i32) {
    %c0_i32 = arith.constant 0 : i32
    %c0_i32_0 = arith.constant 0 : i32
    %c0_i32_1 = arith.constant 0 : i32
    return %c0_i32, %c0_i32_0 : i32, i32
  }
  func.func @transform_4(%arg0: i32) -> (i32, i32) {
    %c0_i32 = arith.constant 0 : i32
    %c0_i32_0 = arith.constant 0 : i32
    %c0_i32_1 = arith.constant 0 : i32
    return %c0_i32, %c0_i32_0 : i32, i32
  }
  func.func @transform_5(%arg0: i32) -> (i32, i32) {
    %c0_i32 = arith.constant 0 : i32
    %c0_i32_0 = arith.constant 0 : i32
    %c0_i32_1 = arith.constant 0 : i32
    return %c0_i32, %c0_i32_0 : i32, i32
  }
  func.func @transform_6(%arg0: i32) -> (i32, i32) {
    %c0_i32 = arith.constant 0 : i32
    %c0_i32_0 = arith.constant 0 : i32
    %c0_i32_1 = arith.constant 0 : i32
    return %c0_i32, %c0_i32_0 : i32, i32
  }
  func.func @transform_7(%arg0: i32) -> (i32, i32, i32) {
    %c0_i32 = arith.constant 0 : i32
    %c0_i32_0 = arith.constant 0 : i32
    %c0_i32_1 = arith.constant 0 : i32
    %c0_i32_2 = arith.constant 0 : i32
    return %c0_i32, %c0_i32_0, %c0_i32_1 : i32, i32, i32
  }
  func.func @transform_8(%arg0: i32) -> (i32, i32, i32) {
    %c0_i32 = arith.constant 0 : i32
    %c0_i32_0 = arith.constant 0 : i32
    %c0_i32_1 = arith.constant 0 : i32
    %c0_i32_2 = arith.constant 0 : i32
    return %c0_i32, %c0_i32_0, %c0_i32_1 : i32, i32, i32
  }
  func.func @transform_9(%arg0: i32) -> (i32, i32) {
    %c0_i32 = arith.constant 0 : i32
    %c0_i32_0 = arith.constant 0 : i32
    return %arg0, %c0_i32 : i32, i32
  }
}

</mosaic_0001>

<bundles_post_ra>
// kernel: tpu_custom_call.1
= control target key start
LH: loop header
LB: loop body
LE: loop exit
PB: predicated region body
PF: predicated region fallthrough
CT: control target
= control target key end

     0   :  { %14 = vsyncpa [#allocation3], 0  ;;  %s2882_s0 = inlined_call_operand.vmem [shape: bf16[16,256], index: 0, kind: input, shape index: {}]   ;;  %s2883_s1 = inlined_call_operand.hbm [shape: bf16[16,256], index: 1, kind: input, shape index: {}]   ;;  %s2884_s2 = inlined_call_operand.vmem [shape: f32[16,1], index: 2, kind: input, shape index: {}]   ;;  %s2885_s3 = inlined_call_operand.hbm [shape: bf16[256,256], index: 3, kind: input, shape index: {}]   ;;  %s2886_s4 = inlined_call_operand.hbm [shape: bf16[256,256], index: 4, kind: input, shape index: {}]   ;;  %s2887_s5 = inlined_call_operand.vmem [shape: f32[1,256], index: 5, kind: input, shape index: {}]   ;;  %s2888_s6 = inlined_call_operand.vmem [shape: f32[1,256], index: 6, kind: input, shape index: {}]   ;;  %s2889_s7 = inlined_call_operand.hbm [shape: bf16[5,256,256], index: 7, kind: input, shape index: {}]   ;;  %s2890_s8 = inlined_call_operand.vmem [shape: f32[5,1,256], index: 8, kind: input, shape index: {}]   ;;  %s2891_s9 = inlined_call_operand.hbm [shape: f32[16,256], index: 9, kind: output, shape index: {}]  }
   0x1   :  { %15 = vsyncpa [#allocation6], 0 }
   0x2   :  { %16 = vsyncpa [#allocation9], 0 }
   0x3   :  { %17 = vsyncpa [#allocation4], 0  ;;  %s2685_s30 = smov [#allocation5]   ;;  %s2686_s11 = smov [#allocation2]  }
   0x4   :  { %s39_s10 = sshll.u32 %s2685_s30, 4  ;;  %s25_s12 = sshll.u32 %s2686_s11, 4  ;;  %s40_s10 = int_to_ptr.vmem [resolvable:$true] %s39_s10  ;;  %s2745_s12 = int_to_ptr.vmem [resolvable:$true] %s25_s12 }
   0x5   :  { %s2567_s15 = scalar_lea.hbm %s2885_s3, 4096 }
   0x6   :  { %p2568_p0 = scmp.ne.s32.totalorder %s2885_s3, %s2567_s15  ;;  %p2571_p1 = scmp.lt.u32.totalorder %s2567_s15, %s2885_s3 }
   0x8   :  { %p2573_p2 = pnand %p2571_p1, %p2568_p0 }
   0xa   :  { %2576 = shalt.err (!%p2573_p2)
}
   0xb   :  { %s2577_s20 = scalar_lea.vmem %s40_s10, 4096  ;;  %p2582_p4 = scmp.lt.s32.totalorder %s40_s10, %s40_s10 }
   0xc   :  { %p2578_p3 = scmp.ne.s32.totalorder %s40_s10, %s2577_s20  ;;  %p2583_p5 = scmp.lt.s32.totalorder %s2577_s20, %s2577_s20 }
   0xe   :  { %p2584_p6 = por %p2583_p5, %p2582_p4 }
  0x10   :  { %p2585_p7 = pnand %p2584_p6, %p2578_p3 }
  0x12   :  { %2588 = shalt.err (!%p2585_p7)
}
  0x13   :  { %s2687_s21 = smov 128   ;;  %s2688_s22 = smov 8  }
  0x14   :  { %45 = dma.hbm_to_vmem [thread:$0]  %s2885_s3, 4096, %s40_s10, [#allocation6], %s2687_s21, %s2687_s21, %s2688_s22  }
  0x15   :  { %s2589_s27 = scalar_lea.hbm %s2883_s1, 256 }
  0x16   :  { %p2590_p8 = scmp.ne.s32.totalorder %s2883_s1, %s2589_s27  ;;  %p2593_p9 = scmp.lt.u32.totalorder %s2589_s27, %s2883_s1 }
  0x18   :  { %p2595_p10 = pnand %p2593_p9, %p2590_p8 }
  0x1a   :  { %2598 = shalt.err (!%p2595_p10)
}
  0x1b   :  { %s2599_s13 = scalar_lea.vmem %s2745_s12, 256  ;;  %p2604_p12 = scmp.lt.s32.totalorder %s2745_s12, %s2745_s12 }
  0x1c   :  { %p2600_p11 = scmp.ne.s32.totalorder %s2745_s12, %s2599_s13  ;;  %p2605_p13 = scmp.lt.s32.totalorder %s2599_s13, %s2599_s13 }
  0x1e   :  { %p2606_p0 = por %p2605_p13, %p2604_p12 }
  0x20   :  { %p2607_p1 = pnand %p2606_p0, %p2600_p11 }
  0x22   :  { %2610 = shalt.err (!%p2607_p1)
}
  0x23   :  { %31 = dma.hbm_to_vmem [thread:$0]  %s2883_s1, 256, %s2745_s12, [#allocation3], %s2687_s21, %s2687_s21, %s2688_s22  }
  0x24   :  { %s2689_s14 = smov [#allocation7]   ;;  %s2690_s16 = smov [#allocation8]  }
  0x25   :  { %s51_s15 = sshll.u32 %s2689_s14, 4  ;;  %s67_s17 = sshll.u32 %s2690_s16, 4  ;;  %s52_s15 = int_to_ptr.vmem [resolvable:$true] %s51_s15  ;;  %s2782_s17 = int_to_ptr.vmem [resolvable:$true] %s67_s17 }
  0x26   :  { %s2611_s20 = scalar_lea.hbm %s2886_s4, 4096 }
  0x27   :  { %p2612_p2 = scmp.ne.s32.totalorder %s2886_s4, %s2611_s20  ;;  %p2615_p3 = scmp.lt.u32.totalorder %s2611_s20, %s2886_s4 }
  0x29   :  { %p2617_p4 = pnand %p2615_p3, %p2612_p2 }
  0x2b   :  { %2620 = shalt.err (!%p2617_p4)
}
  0x2c   :  { %s2621_s1 = scalar_lea.vmem %s52_s15, 4096  ;;  %p2626_p6 = scmp.lt.s32.totalorder %s52_s15, %s52_s15 }
  0x2d   :  { %p2622_p5 = scmp.ne.s32.totalorder %s52_s15, %s2621_s1  ;;  %p2627_p7 = scmp.lt.s32.totalorder %s2621_s1, %s2621_s1 }
  0x2f   :  { %p2628_p8 = por %p2627_p7, %p2626_p6 }
  0x31   :  { %p2629_p9 = pnand %p2628_p8, %p2622_p5 }
  0x33   :  { %2632 = shalt.err (!%p2629_p9)
}
  0x34   :  { %57 = dma.hbm_to_vmem [thread:$0]  %s2886_s4, 4096, %s52_s15, [#allocation6], %s2687_s21, %s2687_s21, %s2688_s22  }
  0x35   :  { %s2633_s30 = scalar_lea.hbm %s2889_s7, 20480 }
  0x36   :  { %p2634_p10 = scmp.ne.s32.totalorder %s2889_s7, %s2633_s30  ;;  %p2637_p11 = scmp.lt.u32.totalorder %s2633_s30, %s2889_s7 }
  0x38   :  { %p2639_p12 = pnand %p2637_p11, %p2634_p10 }
  0x3a   :  { %2642 = shalt.err (!%p2639_p12)
}
  0x3b   :  { %s2643_s14 = scalar_lea.vmem %s2782_s17, 20480  ;;  %p2648_p0 = scmp.lt.s32.totalorder %s2782_s17, %s2782_s17 }
  0x3c   :  { %p2644_p13 = scmp.ne.s32.totalorder %s2782_s17, %s2643_s14  ;;  %p2649_p1 = scmp.lt.s32.totalorder %s2643_s14, %s2643_s14 }
  0x3e   :  { %p2650_p2 = por %p2649_p1, %p2648_p0 }
  0x40   :  { %p2651_p3 = pnand %p2650_p2, %p2644_p13 }
  0x42   :  { %2654 = shalt.err (!%p2651_p3)
}
  0x43   :  { %73 = dma.hbm_to_vmem [thread:$0]  %s2889_s7, 20480, %s2782_s17, [#allocation9], %s2687_s21, %s2687_s21, %s2688_s22  }
  0x44   :  { %2677 = dma.done.wait [#allocation3], 256  }
  0x45   :  { %2678 = vsyncadd [#allocation3], 4294967040 }
  0x46   :  { %2679 = dma.done.wait [#allocation6], 8192  }
  0x47   :  { %2680 = vsyncadd [#allocation6], 4294959104 }
  0x48   :  { %2681 = dma.done.wait [#allocation9], 20480  }
  0x49   :  { %2682 = vsyncadd [#allocation9], 4294946816  ;;  %v2225_v0 = vld [vmem:[#allocation7 + $0x4] ss:$8 sps:$4 sm:$0xff]   ;;  %v2227_v1 = vld [vmem:[#allocation7] ss:$8 sps:$4 sm:$0xff]  }
  0x4a   :  { %326 = vmatprep.subr.bf16.mxu0 %v2225_v0  ;;  %v2228_v2 = vld [vmem:[#allocation7 + $0x14] ss:$8 sps:$4 sm:$0xff]   ;;  %v2230_v3 = vld [vmem:[#allocation7 + $0x10] ss:$8 sps:$4 sm:$0xff]   ;;  %v2691_v4 = vmov 0   ;;  %s2692_s11 = smov [#allocation10]  }
  0x4b   :  { %327 = vmatpush1.bf16.msra.mxu0 %v2227_v1  ;;  %2224 = vset.pattern.permute.xlu0 %v2691_v4  ;;  %v2231_v5 = vld [vmem:[#allocation7 + $0x24] ss:$8 sps:$4 sm:$0xff]   ;;  %v2233_v6 = vld [vmem:[#allocation7 + $0x20] ss:$8 sps:$4 sm:$0xff]   ;;  %v2234_v7 = vld [vmem:[#allocation7 + $0x34] ss:$8 sps:$4 sm:$0xff]  }
  0x4c   :  { %328 = vmatprep.subr.bf16.mxu0 %v2228_v2  ;;  %v2236_v8 = vld [vmem:[#allocation7 + $0x30] ss:$8 sps:$4 sm:$0xff]   ;;  %v2237_v9 = vld [vmem:[#allocation7 + $0x44] ss:$8 sps:$4 sm:$0xff]   ;;  %v2239_v10 = vld [vmem:[#allocation7 + $0x40] ss:$8 sps:$4 sm:$0xff]  }
  0x4d   :  { %v2240_v11 = vld [vmem:[#allocation7 + $0x54] ss:$8 sps:$4 sm:$0xff]   ;;  %v2242_v12 = vld [vmem:[#allocation7 + $0x50] ss:$8 sps:$4 sm:$0xff]   ;;  %v2243_v13 = vld [vmem:[#allocation7 + $0x64] ss:$8 sps:$4 sm:$0xff]  }
  0x4e   :  { %v2275_v14 = vld [vmem:[#allocation2 + $0x4] ss:$8 sps:$4 sm:$0xff]   ;;  %v2245_v15 = vld [vmem:[#allocation7 + $0x60] ss:$8 sps:$4 sm:$0xff]   ;;  %v2248_v17 = vld [vmem:[#allocation7 + $0x70] ss:$8 sps:$4 sm:$0xff]  }
  0x4f   :  { %329 = vmatpush1.bf16.msra.mxu0 %v2230_v3  ;;  %v2246_v16 = vld [vmem:[#allocation7 + $0x74] ss:$8 sps:$4 sm:$0xff]   ;;  %358 = vmatprep.mubr.bf16.mxu0 %v2275_v14  ;;  %v2249_v18 = vld [vmem:[#allocation7 + $0x84] ss:$8 sps:$4 sm:$0xff]   ;;  %v2251_v19 = vld [vmem:[#allocation7 + $0x80] ss:$8 sps:$4 sm:$0xff]  }
  0x50   :  { %330 = vmatprep.subr.bf16.mxu0 %v2231_v5  ;;  %v2252_v20 = vld [vmem:[#allocation7 + $0x94] ss:$8 sps:$4 sm:$0xff]   ;;  %v2254_v21 = vld [vmem:[#allocation7 + $0x90] ss:$8 sps:$4 sm:$0xff]   ;;  %v2255_v22 = vld [vmem:[#allocation7 + $0xa4] ss:$8 sps:$4 sm:$0xff]  }
  0x51   :  { %v2257_v23 = vld [vmem:[#allocation7 + $0xa0] ss:$8 sps:$4 sm:$0xff]   ;;  %v2258_v24 = vld [vmem:[#allocation7 + $0xb4] ss:$8 sps:$4 sm:$0xff]   ;;  %v2260_v25 = vld [vmem:[#allocation7 + $0xb0] ss:$8 sps:$4 sm:$0xff]  }
  0x52   :  { %v2261_v26 = vld [vmem:[#allocation7 + $0xc4] ss:$8 sps:$4 sm:$0xff]   ;;  %v2263_v27 = vld [vmem:[#allocation7 + $0xc0] ss:$8 sps:$4 sm:$0xff]   ;;  %v582_v28 = vld [vmem:[%s2884_s2] sm:$0xff]  ;;  %s1964_s13 = sshll.u32 %s2692_s11, 4  ;;  %s1965_s13 = int_to_ptr.vmem [resolvable:$true] %s1964_s13 }
  0x53   :  { %331 = vmatpush1.bf16.msra.mxu0 %v2233_v6  ;;  %v583_v29 = vld [vmem:[%s2884_s2 + $0x8] sm:$0xff]  ;;  %587 = vperm.xlu0 %2224, %v582_v28   ;;  %v2327_v30 = vld [vmem:[#allocation8 + $0x4] ss:$8 sps:$4 sm:$0xff]   ;;  %v2329_v31 = vld [vmem:[#allocation8] ss:$8 sps:$4 sm:$0xff]   ;;  %p2660_p5 = scmp.lt.s32.totalorder %s1965_s13, %s1965_s13 }
  0x54   :  { %332 = vmatprep.subr.bf16.mxu0 %v2234_v7  ;;  %v2264_v32 = vld [vmem:[#allocation7 + $0xd4] ss:$8 sps:$4 sm:$0xff]   ;;  %848 = vmatprep.subr.bf16.mxu1 %v2327_v30  ;;  %v2332_v34 = vld [vmem:[#allocation8 + $0x10] ss:$8 sps:$4 sm:$0xff]   ;;  %v2333_v35 = vld [vmem:[#allocation8 + $0x24] ss:$8 sps:$4 sm:$0xff]  }
  0x55   :  { %v2330_v33 = vld [vmem:[#allocation8 + $0x14] ss:$8 sps:$4 sm:$0xff]   ;;  %849 = vmatpush1.bf16.msra.mxu1 %v2329_v31  ;;  %v2266_v36 = vld [vmem:[#allocation7 + $0xd0] ss:$8 sps:$4 sm:$0xff]   ;;  %v2267_v37 = vld [vmem:[#allocation7 + $0xe4] ss:$8 sps:$4 sm:$0xff]  }
  0x56   :  { %850 = vmatprep.subr.bf16.mxu1 %v2330_v33  ;;  %v2335_v38 = vld [vmem:[#allocation8 + $0x20] ss:$8 sps:$4 sm:$0xff]   ;;  %v2336_v39 = vld [vmem:[#allocation8 + $0x34] ss:$8 sps:$4 sm:$0xff]   ;;  %v2338_v42 = vld [vmem:[#allocation8 + $0x30] ss:$8 sps:$4 sm:$0xff]  }
  0x57   :  { %333 = vmatpush1.bf16.msra.mxu0 %v2236_v8  ;;  %592 = vperm.xlu0 %2224, %v583_v29   ;;  %v2269_v40 = vld [vmem:[#allocation7 + $0xe0] ss:$8 sps:$4 sm:$0xff]   ;;  %v2270_v41 = vld [vmem:[#allocation7 + $0xf4] ss:$8 sps:$4 sm:$0xff]   ;;  %v2339_v43 = vld [vmem:[#allocation8 + $0x44] ss:$8 sps:$4 sm:$0xff]  }
  0x58   :  { %334 = vmatprep.subr.bf16.mxu0 %v2237_v9  ;;  %v2272_v44 = vld [vmem:[#allocation7 + $0xf0] ss:$8 sps:$4 sm:$0xff]   ;;  %v2278_v46 = vld [vmem:[#allocation5 + $0x4] ss:$8 sps:$4 sm:$0xff]   ;;  %v2276_v47 = vld [vmem:[#allocation5] ss:$8 sps:$4 sm:$0xff]  }
  0x59   :  { %851 = vmatpush1.bf16.msra.mxu1 %v2332_v34  ;;  %v2273_v45 = vld [vmem:[#allocation2] ss:$8 sps:$4 sm:$0xff]   ;;  %v2341_v48 = vld [vmem:[#allocation8 + $0x40] ss:$8 sps:$4 sm:$0xff]   ;;  %v2281_v49 = vld [vmem:[#allocation5 + $0x14] ss:$8 sps:$4 sm:$0xff]  }
  0x5a   :  { %852 = vmatprep.subr.bf16.mxu1 %v2333_v35  ;;  %v2342_v50 = vld [vmem:[#allocation8 + $0x54] ss:$8 sps:$4 sm:$0xff]   ;;  %v2344_v52 = vld [vmem:[#allocation8 + $0x50] ss:$8 sps:$4 sm:$0xff]   ;;  %v2345_v53 = vld [vmem:[#allocation8 + $0x64] ss:$8 sps:$4 sm:$0xff]  }
  0x5b   :  { %335 = vmatpush1.bf16.msra.mxu0 %v2239_v10  ;;  %v2326_v51 = vld [vmem:[%s2882_s0 + $0x4] ss:$8 sps:$4 sm:$0xff]   ;;  %v2279_v54 = vld [vmem:[#allocation5 + $0x10] ss:$8 sps:$4 sm:$0xff]   ;;  %v2284_v55 = vld [vmem:[#allocation5 + $0x24] ss:$8 sps:$4 sm:$0xff]  }
  0x5c   :  { %336 = vmatprep.subr.bf16.mxu0 %v2240_v11  ;;  %v2347_v56 = vld [vmem:[#allocation8 + $0x60] ss:$8 sps:$4 sm:$0xff]   ;;  %v2348_v57 = vld [vmem:[#allocation8 + $0x74] ss:$8 sps:$4 sm:$0xff]   ;;  %v2350_v60 = vld [vmem:[#allocation8 + $0x70] ss:$8 sps:$4 sm:$0xff]  }
  0x5d   :  { %853 = vmatpush1.bf16.msra.mxu1 %v2335_v38  ;;  %v2282_v58 = vld [vmem:[#allocation5 + $0x20] ss:$8 sps:$4 sm:$0xff]   ;;  %v2287_v59 = vld [vmem:[#allocation5 + $0x34] ss:$8 sps:$4 sm:$0xff]   ;;  %v2351_v61 = vld [vmem:[#allocation8 + $0x84] ss:$8 sps:$4 sm:$0xff]  }
  0x5e   :  { %854 = vmatprep.subr.bf16.mxu1 %v2336_v39  ;;  %v2285_v62 = vld [vmem:[#allocation5 + $0x30] ss:$8 sps:$4 sm:$0xff]   ;;  %v2290_v63 = vld [vmem:[#allocation5 + $0x44] ss:$8 sps:$4 sm:$0xff]   ;;  %v2353_v0 = vld [vmem:[#allocation8 + $0x80] ss:$8 sps:$4 sm:$0xff]  }
  0x5f   :  { %337 = vmatpush1.bf16.msra.mxu0 %v2242_v12  ;;  %v2354_v1 = vld [vmem:[#allocation8 + $0x94] ss:$8 sps:$4 sm:$0xff]   ;;  %v2288_v2 = vld [vmem:[#allocation5 + $0x40] ss:$8 sps:$4 sm:$0xff]   ;;  %v2356_v4 = vld [vmem:[#allocation8 + $0x90] ss:$8 sps:$4 sm:$0xff]  }
  0x60   :  { %338 = vmatprep.subr.bf16.mxu0 %v2243_v13  ;;  %v2293_v3 = vld [vmem:[#allocation5 + $0x54] ss:$8 sps:$4 sm:$0xff]   ;;  %v2357_v5 = vld [vmem:[#allocation8 + $0xa4] ss:$8 sps:$4 sm:$0xff]   ;;  %v2291_v6 = vld [vmem:[#allocation5 + $0x50] ss:$8 sps:$4 sm:$0xff]  }
  0x61   :  { %855 = vmatpush1.bf16.msra.mxu1 %v2338_v42  ;;  %v2296_v7 = vld [vmem:[#allocation5 + $0x64] ss:$8 sps:$4 sm:$0xff]   ;;  %v2359_v8 = vld [vmem:[#allocation8 + $0xa0] ss:$8 sps:$4 sm:$0xff]   ;;  %v2360_v9 = vld [vmem:[#allocation8 + $0xb4] ss:$8 sps:$4 sm:$0xff]  }
  0x62   :  { %856 = vmatprep.subr.bf16.mxu1 %v2339_v43  ;;  %v2294_v10 = vld [vmem:[#allocation5 + $0x60] ss:$8 sps:$4 sm:$0xff]   ;;  %v2299_v11 = vld [vmem:[#allocation5 + $0x74] ss:$8 sps:$4 sm:$0xff]   ;;  %v2362_v12 = vld [vmem:[#allocation8 + $0xb0] ss:$8 sps:$4 sm:$0xff]  }
  0x63   :  { %339 = vmatpush1.bf16.msra.mxu0 %v2245_v15  ;;  %v2363_v13 = vld [vmem:[#allocation8 + $0xc4] ss:$8 sps:$4 sm:$0xff]   ;;  %v2297_v14 = vld [vmem:[#allocation5 + $0x70] ss:$8 sps:$4 sm:$0xff]   ;;  %v2318_v29 = vld [vmem:[#allocation5 + $0xe0] ss:$8 sps:$4 sm:$0xff]  }
  0x64   :  { %340 = vmatprep.subr.bf16.mxu0 %v2246_v16  ;;  %v2302_v15 = vld [vmem:[#allocation5 + $0x84] ss:$8 sps:$4 sm:$0xff]   ;;  %v2365_v16 = vld [vmem:[#allocation8 + $0xc0] ss:$8 sps:$4 sm:$0xff]   ;;  %v2323_v30 = vld [vmem:[#allocation5 + $0xf4] ss:$8 sps:$4 sm:$0xff]  }
  0x65   :  { %857 = vmatpush1.bf16.msra.mxu1 %v2341_v48  ;;  %v2320_v28 = vld [vmem:[#allocation5 + $0xe4] ss:$8 sps:$4 sm:$0xff]   ;;  %v2321_v31 = vld [vmem:[#allocation5 + $0xf0] ss:$8 sps:$4 sm:$0xff]   ;;  %v2366_v33 = vld [vmem:[#allocation8 + $0xd4] ss:$8 sps:$4 sm:$0xff]  }
  0x66   :  { %858 = vmatprep.subr.bf16.mxu1 %v2342_v50  ;;  %v2368_v34 = vld [vmem:[#allocation8 + $0xd0] ss:$8 sps:$4 sm:$0xff]   ;;  %v2369_v35 = vld [vmem:[#allocation8 + $0xe4] ss:$8 sps:$4 sm:$0xff]  }
  0x67   :  { %341 = vmatpush1.bf16.msra.mxu0 %v2248_v17  ;;  %v2300_v17 = vld [vmem:[#allocation5 + $0x80] ss:$8 sps:$4 sm:$0xff]   ;;  %v2374_v38 = vld [vmem:[#allocation8 + $0xf0] ss:$8 sps:$4 sm:$0xff]   ;;  %v2377_v39 = vld [vmem:[#allocation8 + $0x104] ss:$8 sps:$4 sm:$0xff]  }
  0x68   :  { %342 = vmatprep.subr.bf16.mxu0 %v2249_v18  ;;  %v2305_v18 = vld [vmem:[#allocation5 + $0x94] ss:$8 sps:$4 sm:$0xff]   ;;  %v584_v43 = vld [vmem:[%s2887_s5] sm:$0x3] }
  0x69   :  { %859 = vmatpush1.bf16.msra.mxu1 %v2344_v52  ;;  %v614_v48 = vld [vmem:[%s2888_s6] sm:$0x3] }
  0x6a   :  { %860 = vmatprep.subr.bf16.mxu1 %v2345_v53 }
  0x6b   :  { %343 = vmatpush1.bf16.msra.mxu0 %v2251_v19  ;;  %v2303_v19 = vld [vmem:[#allocation5 + $0x90] ss:$8 sps:$4 sm:$0xff]  }
  0x6c   :  { %344 = vmatprep.subr.bf16.mxu0 %v2252_v20  ;;  %v2308_v20 = vld [vmem:[#allocation5 + $0xa4] ss:$8 sps:$4 sm:$0xff]  }
  0x6d   :  { %861 = vmatpush1.bf16.msra.mxu1 %v2347_v56 }
  0x6e   :  { %862 = vmatprep.subr.bf16.mxu1 %v2348_v57 }
  0x6f   :  { %345 = vmatpush1.bf16.msra.mxu0 %v2254_v21  ;;  %v2306_v21 = vld [vmem:[#allocation5 + $0xa0] ss:$8 sps:$4 sm:$0xff]  }
  0x70   :  { %346 = vmatprep.subr.bf16.mxu0 %v2255_v22  ;;  %v2311_v22 = vld [vmem:[#allocation5 + $0xb4] ss:$8 sps:$4 sm:$0xff]  }
  0x71   :  { %863 = vmatpush1.bf16.msra.mxu1 %v2350_v60 }
  0x72   :  { %864 = vmatprep.subr.bf16.mxu1 %v2351_v61 }
  0x73   :  { %347 = vmatpush1.bf16.msra.mxu0 %v2257_v23  ;;  %v2309_v23 = vld [vmem:[#allocation5 + $0xb0] ss:$8 sps:$4 sm:$0xff]  }
  0x74   :  { %348 = vmatprep.subr.bf16.mxu0 %v2258_v24  ;;  %v2314_v24 = vld [vmem:[#allocation5 + $0xc4] ss:$8 sps:$4 sm:$0xff]  }
  0x75   :  { %865 = vmatpush1.bf16.msra.mxu1 %v2353_v0 }
  0x76   :  { %866 = vmatprep.subr.bf16.mxu1 %v2354_v1 }
  0x77   :  { %349 = vmatpush1.bf16.msra.mxu0 %v2260_v25  ;;  %v2312_v25 = vld [vmem:[#allocation5 + $0xc0] ss:$8 sps:$4 sm:$0xff]  }
  0x78   :  { %350 = vmatprep.subr.bf16.mxu0 %v2261_v26  ;;  %v2317_v26 = vld [vmem:[#allocation5 + $0xd4] ss:$8 sps:$4 sm:$0xff]  }
  0x79   :  { %867 = vmatpush1.bf16.msra.mxu1 %v2356_v4 }
  0x7a   :  { %868 = vmatprep.subr.bf16.mxu1 %v2357_v5 }
  0x7b   :  { %351 = vmatpush1.bf16.msra.mxu0 %v2263_v27  ;;  %v2315_v27 = vld [vmem:[#allocation5 + $0xd0] ss:$8 sps:$4 sm:$0xff]  }
  0x7c   :  { %352 = vmatprep.subr.bf16.mxu0 %v2264_v32  ;;  %v2324_v32 = vld [vmem:[%s2882_s0] ss:$8 sps:$4 sm:$0xff]  }
  0x7d   :  { %869 = vmatpush1.bf16.msra.mxu1 %v2359_v8 }
  0x7e   :  { %870 = vmatprep.subr.bf16.mxu1 %v2360_v9 }
  0x7f   :  { %353 = vmatpush1.bf16.msra.mxu0 %v2266_v36  ;;  %v2371_v36 = vld [vmem:[#allocation8 + $0xe0] ss:$8 sps:$4 sm:$0xff]  }
  0x80   :  { %354 = vmatprep.subr.bf16.mxu0 %v2267_v37  ;;  %v2372_v37 = vld [vmem:[#allocation8 + $0xf4] ss:$8 sps:$4 sm:$0xff]  }
  0x81   :  { %871 = vmatpush1.bf16.msra.mxu1 %v2362_v12 }
  0x82   :  { %872 = vmatprep.subr.bf16.mxu1 %v2363_v13 }
  0x83   :  { %355 = vmatpush1.bf16.msra.mxu0 %v2269_v40  ;;  %v596_v40 = vlaneseq }
  0x84   :  { %356 = vmatprep.subr.bf16.mxu0 %v2270_v41 }
  0x85   :  { %873 = vmatpush1.bf16.msra.mxu1 %v2365_v16  ;;  %v597_v41 = vshrl.u32 %v596_v40, 7  ;;  %v2378_v16 = vld [vmem:[#allocation8 + $0x110] ss:$8 sps:$4 sm:$0xff]  }
  0x86   :  { %874 = vmatprep.subr.bf16.mxu1 %v2366_v33  ;;  %v2407_v33 = vld [vmem:[#allocation8 + $0x1a4] ss:$8 sps:$4 sm:$0xff]   ;;  %v2414_v40 = vld [vmem:[#allocation8 + $0x1d0] ss:$8 sps:$4 sm:$0xff]  }
  0x87   :  { %357 = vmatpush1.bf16.msra.mxu0 %v2272_v44  ;;  %v2831_v42 = vsub.s32 0, %v597_v41  ;;  %v2836_v44 = vsub.s32 1, %v597_v41  ;;  %v2419_v41 = vld [vmem:[#allocation8 + $0x1e4] ss:$8 sps:$4 sm:$0xff]  }
  0x88   :  { %539 = vmatprep.subr.bf16.mxu0 %v2278_v46 }
  0x89   :  { %875 = vmatpush1.bf16.msra.mxu1 %v2368_v34  ;;  %v599_v46 = vrot.slane %v584_v43, %v2831_v42  ;;  %v2405_v34 = vld [vmem:[#allocation8 + $0x1a0] ss:$8 sps:$4 sm:$0xff]  }
  0x8a   :  { %359 = vmatmul.mubr.bf16.vlgmr.msra.gmra.mrb[0].mxu0 %v2273_v45  ;;  %876 = vmatprep.subr.bf16.mxu1 %v2369_v35  ;;  %v2410_v35 = vld [vmem:[#allocation8 + $0x1b4] ss:$8 sps:$4 sm:$0xff]  }
  0x8b   :  { %540 = vmatpush1.bf16.msra.mxu0 %v2276_v47  ;;  %571 = vmatprep.mubr.bf16.mxu0 %v2326_v51  ;;  %v603_v47 = vrot.slane %v584_v43, %v2836_v44  ;;  %v619_v51 = vrot.slane %v614_v48, %v2831_v42  ;;  %v2417_v43 = vld [vmem:[#allocation8 + $0x1e0] ss:$8 sps:$4 sm:$0xff]  }
  0x8c   :  { %541 = vmatprep.subr.bf16.mxu0 %v2281_v49 }
  0x8d   :  { %877 = vmatpush1.bf16.msra.mxu1 %v2371_v36  ;;  %v2408_v36 = vld [vmem:[#allocation8 + $0x1b0] ss:$8 sps:$4 sm:$0xff]  }
  0x8e   :  { %878 = vmatprep.subr.bf16.mxu1 %v2372_v37  ;;  %v2413_v37 = vld [vmem:[#allocation8 + $0x1c4] ss:$8 sps:$4 sm:$0xff]  }
  0x8f   :  { %542 = vmatpush1.bf16.msra.mxu0 %v2279_v54  ;;  %v623_v54 = vrot.slane %v614_v48, %v2836_v44  ;;  %v2425_v48 = vld [vmem:[#allocation8 + $0x204] ss:$8 sps:$4 sm:$0xff]  }
  0x90   :  { %543 = vmatprep.subr.bf16.mxu0 %v2284_v55 }
  0x91   :  { %879 = vmatpush1.bf16.msra.mxu1 %v2374_v38  ;;  %v2411_v38 = vld [vmem:[#allocation8 + $0x1c0] ss:$8 sps:$4 sm:$0xff]  }
  0x92   :  { %1111 = vmatprep.subr.bf16.mxu1 %v2377_v39  ;;  %v2416_v39 = vld [vmem:[#allocation8 + $0x1d4] ss:$8 sps:$4 sm:$0xff]  }
  0x93   :  { %544 = vmatpush1.bf16.msra.mxu0 %v2282_v58 }
  0x94   :  { %545 = vmatprep.subr.bf16.mxu0 %v2287_v59 }
  0x97   :  { %546 = vmatpush1.bf16.msra.mxu0 %v2285_v62 }
  0x98   :  { %547 = vmatprep.subr.bf16.mxu0 %v2290_v63 }
  0x9b   :  { %548 = vmatpush1.bf16.msra.mxu0 %v2288_v2 }
  0x9c   :  { %549 = vmatprep.subr.bf16.mxu0 %v2293_v3 }
  0x9f   :  { %550 = vmatpush1.bf16.msra.mxu0 %v2291_v6 }
  0xa0   :  { %551 = vmatprep.subr.bf16.mxu0 %v2296_v7 }
  0xa3   :  { %552 = vmatpush1.bf16.msra.mxu0 %v2294_v10 }
  0xa4   :  { %553 = vmatprep.subr.bf16.mxu0 %v2299_v11 }
  0xa7   :  { %554 = vmatpush1.bf16.msra.mxu0 %v2297_v14  ;;  %v2375_v14 = vld [vmem:[#allocation8 + $0x100] ss:$8 sps:$4 sm:$0xff]  }
  0xa8   :  { %555 = vmatprep.subr.bf16.mxu0 %v2302_v15  ;;  %v2380_v15 = vld [vmem:[#allocation8 + $0x114] ss:$8 sps:$4 sm:$0xff]  }
  0xab   :  { %556 = vmatpush1.bf16.msra.mxu0 %v2300_v17  ;;  %v2383_v17 = vld [vmem:[#allocation8 + $0x124] ss:$8 sps:$4 sm:$0xff]  }
  0xac   :  { %557 = vmatprep.subr.bf16.mxu0 %v2305_v18  ;;  %v2381_v18 = vld [vmem:[#allocation8 + $0x120] ss:$8 sps:$4 sm:$0xff]  }
  0xaf   :  { %558 = vmatpush1.bf16.msra.mxu0 %v2303_v19  ;;  %v2386_v19 = vld [vmem:[#allocation8 + $0x134] ss:$8 sps:$4 sm:$0xff]  }
  0xb0   :  { %559 = vmatprep.subr.bf16.mxu0 %v2308_v20  ;;  %v2384_v20 = vld [vmem:[#allocation8 + $0x130] ss:$8 sps:$4 sm:$0xff]  }
  0xb3   :  { %560 = vmatpush1.bf16.msra.mxu0 %v2306_v21  ;;  %v2389_v21 = vld [vmem:[#allocation8 + $0x144] ss:$8 sps:$4 sm:$0xff]  }
  0xb4   :  { %561 = vmatprep.subr.bf16.mxu0 %v2311_v22  ;;  %v2387_v22 = vld [vmem:[#allocation8 + $0x140] ss:$8 sps:$4 sm:$0xff]  }
  0xb7   :  { %562 = vmatpush1.bf16.msra.mxu0 %v2309_v23  ;;  %v2392_v23 = vld [vmem:[#allocation8 + $0x154] ss:$8 sps:$4 sm:$0xff]  }
  0xb8   :  { %563 = vmatprep.subr.bf16.mxu0 %v2314_v24  ;;  %v2390_v24 = vld [vmem:[#allocation8 + $0x150] ss:$8 sps:$4 sm:$0xff]  }
  0xbb   :  { %564 = vmatpush1.bf16.msra.mxu0 %v2312_v25  ;;  %v2395_v25 = vld [vmem:[#allocation8 + $0x164] ss:$8 sps:$4 sm:$0xff]  }
  0xbc   :  { %565 = vmatprep.subr.bf16.mxu0 %v2317_v26  ;;  %v2393_v26 = vld [vmem:[#allocation8 + $0x160] ss:$8 sps:$4 sm:$0xff]  }
  0xbf   :  { %566 = vmatpush1.bf16.msra.mxu0 %v2315_v27  ;;  %v2398_v27 = vld [vmem:[#allocation8 + $0x174] ss:$8 sps:$4 sm:$0xff]  }
  0xc0   :  { %567 = vmatprep.subr.bf16.mxu0 %v2320_v28  ;;  %v2396_v28 = vld [vmem:[#allocation8 + $0x170] ss:$8 sps:$4 sm:$0xff]  }
  0xc3   :  { %568 = vmatpush1.bf16.msra.mxu0 %v2318_v29  ;;  %v2401_v29 = vld [vmem:[#allocation8 + $0x184] ss:$8 sps:$4 sm:$0xff]  }
  0xc4   :  { %569 = vmatprep.subr.bf16.mxu0 %v2323_v30  ;;  %v2399_v30 = vld [vmem:[#allocation8 + $0x180] ss:$8 sps:$4 sm:$0xff]  }
  0xc7   :  { %570 = vmatpush1.bf16.msra.mxu0 %v2321_v31  ;;  %v2404_v31 = vld [vmem:[#allocation8 + $0x194] ss:$8 sps:$4 sm:$0xff]  }
  0xc8   :  { %1374 = vmatprep.subr.bf16.mxu0 %v2425_v48  ;;  %v2488_v48 = vld [vmem:[#allocation8 + $0x354] ss:$8 sps:$4 sm:$0xff]  }
  0xca   :  { %572 = vmatmul.mubr.bf16.vlgmr.msra.gmra.mrb[0].mxu0 %v2324_v32  ;;  %v2402_v32 = vld [vmem:[#allocation8 + $0x190] ss:$8 sps:$4 sm:$0xff]  }
  0xd2   :  { %v588_v45 = vpop.permute.xlu0 %587 }
  0xd3   :  { %v606_v49 = vmul.f32 %v599_v46, %v588_v45  ;;  %v607_v52 = vmul.f32 %v603_v47, %v588_v45  ;;  %v2422_v45 = vld [vmem:[#allocation8 + $0x1f4] ss:$8 sps:$4 sm:$0xff]  }
  0xd6   :  { %v593_v50 = vpop.permute.xlu0 %592 }
  0xd7   :  { %v608_v55 = vmul.f32 %v599_v46, %v593_v50  ;;  %v609_v58 = vmul.f32 %v603_v47, %v593_v50  ;;  %v2420_v46 = vld [vmem:[#allocation8 + $0x1f0] ss:$8 sps:$4 sm:$0xff]   ;;  %v2423_v47 = vld [vmem:[#allocation8 + $0x200] ss:$8 sps:$4 sm:$0xff]  }
  0xd8   :  { %1375 = vmatpush1.bf16.msra.mxu0 %v2423_v47  ;;  %v2426_v50 = vld [vmem:[#allocation8 + $0x210] ss:$8 sps:$4 sm:$0xff]   ;;  %v2483_v47 = vld [vmem:[#allocation8 + $0x340] ss:$8 sps:$4 sm:$0xff]  }
 0x19d   :  { %v573_v53 = vpop.f32.mrb[0].mxu0 }
 0x19e   :  { %v610_v56 = vadd.f32 %v606_v49, %v573_v53  ;;  %v575_v57 = vpop.f32.mrb[1].mxu0  ;;  %v2428_v49 = vld [vmem:[#allocation8 + $0x214] ss:$8 sps:$4 sm:$0xff]  }
 0x19f   :  { %v611_v59 = vadd.f32 %v607_v52, %v575_v57  ;;  %v577_v60 = vpop.f32.mrb[2].mxu0  ;;  %1376 = vmatprep.subr.bf16.mxu0 %v2428_v49  ;;  %v2429_v52 = vld [vmem:[#allocation8 + $0x220] ss:$8 sps:$4 sm:$0xff]   ;;  %v2434_v53 = vld [vmem:[#allocation8 + $0x234] ss:$8 sps:$4 sm:$0xff]  }
 0x1a0   :  { %v626_v61 = vadd.f32 %v619_v51, %v610_v56  ;;  %v612_v62 = vadd.f32 %v608_v55, %v577_v60  ;;  %v579_v63 = vpop.f32.mrb[3].mxu0  ;;  %1377 = vmatpush1.bf16.msra.mxu0 %v2426_v50  ;;  %v2437_v55 = vld [vmem:[#allocation8 + $0x244] ss:$8 sps:$4 sm:$0xff]   ;;  %v2435_v56 = vld [vmem:[#allocation8 + $0x240] ss:$8 sps:$4 sm:$0xff]  }
 0x1a1   :  { %v627_v0 = vadd.f32 %v623_v54, %v611_v59  ;;  %v613_v1 = vadd.f32 %v609_v58, %v579_v63  ;;  %v2440_v57 = vld [vmem:[#allocation8 + $0x254] ss:$8 sps:$4 sm:$0xff]   ;;  %v2438_v58 = vld [vmem:[#allocation8 + $0x250] ss:$8 sps:$4 sm:$0xff]   ;;  %v2443_v59 = vld [vmem:[#allocation8 + $0x264] ss:$8 sps:$4 sm:$0xff]  }
 0x1a2   :  { %v634_v2 = vmul.f32 0.1, %v626_v61  ;;  %v628_v3 = vadd.f32 %v619_v51, %v612_v62  ;;  %vm630_vm0 = vcmp.gt.f32.partialorder %v626_v61, 0.0  ;;  %v2431_v51 = vld [vmem:[#allocation8 + $0x224] ss:$8 sps:$4 sm:$0xff]  }
 0x1a3   :  { %v629_v4 = vadd.f32 %v623_v54, %v613_v1  ;;  %v635_v5 = vmul.f32 0.1, %v627_v0  ;;  %vm631_vm2 = vcmp.gt.f32.partialorder %v627_v0, 0.0  ;;  %1378 = vmatprep.subr.bf16.mxu0 %v2431_v51  ;;  %v2432_v54 = vld [vmem:[#allocation8 + $0x230] ss:$8 sps:$4 sm:$0xff]  }
 0x1a4   :  { %vm632_vm1 = vcmp.gt.f32.partialorder %v628_v3, 0.0  ;;  %v636_v6 = vmul.f32 0.1, %v628_v3  ;;  %v638_v8 = vsel %vm630_vm0, %v626_v61, %v634_v2  ;;  %1379 = vmatpush1.bf16.msra.mxu0 %v2429_v52  ;;  %v2441_v60 = vld [vmem:[#allocation8 + $0x260] ss:$8 sps:$4 sm:$0xff]  }
 0x1a5   :  { %vm633_vm3 = vcmp.gt.f32.partialorder %v629_v4, 0.0  ;;  %v637_v7 = vmul.f32 0.1, %v629_v4  ;;  %v639_v10 = vsel %vm631_vm2, %v627_v0, %v635_v5  ;;  %1380 = vmatprep.subr.bf16.mxu0 %v2434_v53  ;;  %v2446_v61 = vld [vmem:[#allocation8 + $0x274] ss:$8 sps:$4 sm:$0xff]  }
 0x1a6   :  { %v640_v9 = vsel %vm632_vm1, %v628_v3, %v636_v6  ;;  %v2444_v62 = vld [vmem:[#allocation8 + $0x270] ss:$8 sps:$4 sm:$0xff]   ;;  %v2449_v63 = vld [vmem:[#allocation8 + $0x284] ss:$8 sps:$4 sm:$0xff]   ;;  %v2447_v0 = vld [vmem:[#allocation8 + $0x280] ss:$8 sps:$4 sm:$0xff]  }
 0x1a7   :  { %v641_v11 = vsel %vm633_vm3, %v629_v4, %v637_v7  ;;  %v642_v12 = vpack.c.bf16 %v640_v9, %v638_v8  ;;  %v2452_v1 = vld [vmem:[#allocation8 + $0x294] ss:$8 sps:$4 sm:$0xff]   ;;  %v2450_v2 = vld [vmem:[#allocation8 + $0x290] ss:$8 sps:$4 sm:$0xff]   ;;  %v2455_v3 = vld [vmem:[#allocation8 + $0x2a4] ss:$8 sps:$4 sm:$0xff]  }
 0x1a8   :  { %v643_v13 = vpack.c.bf16 %v641_v11, %v639_v10  ;;  %1381 = vmatpush1.bf16.msra.mxu0 %v2432_v54  ;;  %v2453_v4 = vld [vmem:[#allocation8 + $0x2a0] ss:$8 sps:$4 sm:$0xff]   ;;  %v2458_v5 = vld [vmem:[#allocation8 + $0x2b4] ss:$8 sps:$4 sm:$0xff]   ;;  %v2456_v6 = vld [vmem:[#allocation8 + $0x2b0] ss:$8 sps:$4 sm:$0xff]  }
 0x1a9   :  { %1382 = vmatprep.subr.bf16.mxu0 %v2437_v55  ;;  %v2461_v7 = vld [vmem:[#allocation8 + $0x2c4] ss:$8 sps:$4 sm:$0xff]   ;;  %v2459_v8 = vld [vmem:[#allocation8 + $0x2c0] ss:$8 sps:$4 sm:$0xff]   ;;  %v676_v9 = vld [vmem:[%s2890_s8] sm:$0x3] }
 0x1aa   :  { %880 = vmatprep.mubr.bf16.mxu1 %v643_v13  ;;  %v681_v10 = vrot.slane %v676_v9, %v2831_v42  ;;  %v685_v11 = vrot.slane %v676_v9, %v2836_v44  ;;  %v2486_v49 = vld [vmem:[#allocation8 + $0x350] ss:$8 sps:$4 sm:$0xff]   ;;  %v2491_v50 = vld [vmem:[#allocation8 + $0x364] ss:$8 sps:$4 sm:$0xff]   ;;  %v2489_v51 = vld [vmem:[#allocation8 + $0x360] ss:$8 sps:$4 sm:$0xff]  }
 0x1ab   :  { %881 = vmatmul.mubr.bf16.vlgmr.msra.gmra.mrb[0].mxu1 %v642_v12  ;;  %v2494_v52 = vld [vmem:[#allocation8 + $0x374] ss:$8 sps:$4 sm:$0xff]   ;;  %v2492_v53 = vld [vmem:[#allocation8 + $0x370] ss:$8 sps:$4 sm:$0xff]   ;;  %v2497_v54 = vld [vmem:[#allocation8 + $0x384] ss:$8 sps:$4 sm:$0xff]  }
 0x1ac   :  { %1112 = vmatpush1.bf16.msra.mxu1 %v2375_v14  ;;  %1383 = vmatpush1.bf16.msra.mxu0 %v2435_v56  ;;  %v2495_v55 = vld [vmem:[#allocation8 + $0x380] ss:$8 sps:$4 sm:$0xff]   ;;  %v2500_v56 = vld [vmem:[#allocation8 + $0x394] ss:$8 sps:$4 sm:$0xff]  }
 0x1ad   :  { %1113 = vmatprep.subr.bf16.mxu1 %v2380_v15  ;;  %1384 = vmatprep.subr.bf16.mxu0 %v2440_v57  ;;  %v2498_v57 = vld [vmem:[#allocation8 + $0x390] ss:$8 sps:$4 sm:$0xff]  }
 0x1b0   :  { %1114 = vmatpush1.bf16.msra.mxu1 %v2378_v16  ;;  %1385 = vmatpush1.bf16.msra.mxu0 %v2438_v58  ;;  %v2503_v58 = vld [vmem:[#allocation8 + $0x3a4] ss:$8 sps:$4 sm:$0xff]  }
 0x1b1   :  { %1115 = vmatprep.subr.bf16.mxu1 %v2383_v17  ;;  %1386 = vmatprep.subr.bf16.mxu0 %v2443_v59  ;;  %v2501_v59 = vld [vmem:[#allocation8 + $0x3a0] ss:$8 sps:$4 sm:$0xff]  }
 0x1b4   :  { %1116 = vmatpush1.bf16.msra.mxu1 %v2381_v18  ;;  %1387 = vmatpush1.bf16.msra.mxu0 %v2441_v60  ;;  %v2506_v60 = vld [vmem:[#allocation8 + $0x3b4] ss:$8 sps:$4 sm:$0xff]  }
 0x1b5   :  { %1117 = vmatprep.subr.bf16.mxu1 %v2386_v19  ;;  %1388 = vmatprep.subr.bf16.mxu0 %v2446_v61  ;;  %v2504_v61 = vld [vmem:[#allocation8 + $0x3b0] ss:$8 sps:$4 sm:$0xff]  }
 0x1b8   :  { %1118 = vmatpush1.bf16.msra.mxu1 %v2384_v20  ;;  %1389 = vmatpush1.bf16.msra.mxu0 %v2444_v62  ;;  %v2509_v62 = vld [vmem:[#allocation8 + $0x3c4] ss:$8 sps:$4 sm:$0xff]  }
 0x1b9   :  { %1119 = vmatprep.subr.bf16.mxu1 %v2389_v21  ;;  %1390 = vmatprep.subr.bf16.mxu0 %v2449_v63  ;;  %v2507_v63 = vld [vmem:[#allocation8 + $0x3c0] ss:$8 sps:$4 sm:$0xff]  }
 0x1bc   :  { %1120 = vmatpush1.bf16.msra.mxu1 %v2387_v22  ;;  %1391 = vmatpush1.bf16.msra.mxu0 %v2447_v0  ;;  %v2078_v0 = vld [vmem:[%s2890_s8 + $0x2] sm:$0x3] }
 0x1bd   :  { %1121 = vmatprep.subr.bf16.mxu1 %v2392_v23  ;;  %1392 = vmatprep.subr.bf16.mxu0 %v2452_v1  ;;  %v944_v1 = vrot.slane %v2078_v0, %v2831_v42 }
 0x1c0   :  { %1122 = vmatpush1.bf16.msra.mxu1 %v2390_v24  ;;  %1393 = vmatpush1.bf16.msra.mxu0 %v2450_v2  ;;  %v948_v2 = vrot.slane %v2078_v0, %v2836_v44 }
 0x1c1   :  { %1123 = vmatprep.subr.bf16.mxu1 %v2395_v25  ;;  %1394 = vmatprep.subr.bf16.mxu0 %v2455_v3 }
 0x1c4   :  { %1124 = vmatpush1.bf16.msra.mxu1 %v2393_v26  ;;  %1395 = vmatpush1.bf16.msra.mxu0 %v2453_v4 }
 0x1c5   :  { %1125 = vmatprep.subr.bf16.mxu1 %v2398_v27  ;;  %1396 = vmatprep.subr.bf16.mxu0 %v2458_v5 }
 0x1c8   :  { %1126 = vmatpush1.bf16.msra.mxu1 %v2396_v28  ;;  %1397 = vmatpush1.bf16.msra.mxu0 %v2456_v6 }
 0x1c9   :  { %1127 = vmatprep.subr.bf16.mxu1 %v2401_v29  ;;  %1398 = vmatprep.subr.bf16.mxu0 %v2461_v7 }
 0x1cc   :  { %1128 = vmatpush1.bf16.msra.mxu1 %v2399_v30  ;;  %1399 = vmatpush1.bf16.msra.mxu0 %v2459_v8  ;;  %v2464_v30 = vld [vmem:[#allocation8 + $0x2d4] ss:$8 sps:$4 sm:$0xff]  }
 0x1cd   :  { %1129 = vmatprep.subr.bf16.mxu1 %v2404_v31  ;;  %v2462_v31 = vld [vmem:[#allocation8 + $0x2d0] ss:$8 sps:$4 sm:$0xff]   ;;  %1400 = vmatprep.subr.bf16.mxu0 %v2464_v30 }
 0x1ce   :  { %v2522_v30 = vld [vmem:[#allocation8 + $0x410] ss:$8 sps:$4 sm:$0xff]  }
 0x1d0   :  { %1130 = vmatpush1.bf16.msra.mxu1 %v2402_v32  ;;  %1401 = vmatpush1.bf16.msra.mxu0 %v2462_v31  ;;  %v2467_v32 = vld [vmem:[#allocation8 + $0x2e4] ss:$8 sps:$4 sm:$0xff]  }
 0x1d1   :  { %1131 = vmatprep.subr.bf16.mxu1 %v2407_v33  ;;  %v2465_v33 = vld [vmem:[#allocation8 + $0x2e0] ss:$8 sps:$4 sm:$0xff]   ;;  %1402 = vmatprep.subr.bf16.mxu0 %v2467_v32  ;;  %v2527_v31 = vld [vmem:[#allocation8 + $0x424] ss:$8 sps:$4 sm:$0xff]  }
 0x1d2   :  { %v2525_v32 = vld [vmem:[#allocation8 + $0x420] ss:$8 sps:$4 sm:$0xff]  }
 0x1d4   :  { %1132 = vmatpush1.bf16.msra.mxu1 %v2405_v34  ;;  %1403 = vmatpush1.bf16.msra.mxu0 %v2465_v33  ;;  %v2470_v34 = vld [vmem:[#allocation8 + $0x2f4] ss:$8 sps:$4 sm:$0xff]  }
 0x1d5   :  { %1133 = vmatprep.subr.bf16.mxu1 %v2410_v35  ;;  %v2468_v35 = vld [vmem:[#allocation8 + $0x2f0] ss:$8 sps:$4 sm:$0xff]   ;;  %1404 = vmatprep.subr.bf16.mxu0 %v2470_v34  ;;  %v2530_v33 = vld [vmem:[#allocation8 + $0x434] ss:$8 sps:$4 sm:$0xff]  }
 0x1d6   :  { %v2528_v34 = vld [vmem:[#allocation8 + $0x430] ss:$8 sps:$4 sm:$0xff]  }
 0x1d8   :  { %1134 = vmatpush1.bf16.msra.mxu1 %v2408_v36  ;;  %1405 = vmatpush1.bf16.msra.mxu0 %v2468_v35  ;;  %v2471_v36 = vld [vmem:[#allocation8 + $0x300] ss:$8 sps:$4 sm:$0xff]   ;;  %v2533_v35 = vld [vmem:[#allocation8 + $0x444] ss:$8 sps:$4 sm:$0xff]  }
 0x1d9   :  { %1135 = vmatprep.subr.bf16.mxu1 %v2413_v37  ;;  %v2473_v37 = vld [vmem:[#allocation8 + $0x304] ss:$8 sps:$4 sm:$0xff]  }
 0x1dc   :  { %1136 = vmatpush1.bf16.msra.mxu1 %v2411_v38  ;;  %v2476_v38 = vld [vmem:[#allocation8 + $0x314] ss:$8 sps:$4 sm:$0xff]  }
 0x1dd   :  { %1137 = vmatprep.subr.bf16.mxu1 %v2416_v39  ;;  %v2474_v39 = vld [vmem:[#allocation8 + $0x310] ss:$8 sps:$4 sm:$0xff]  }
 0x1e0   :  { %1138 = vmatpush1.bf16.msra.mxu1 %v2414_v40  ;;  %v2479_v40 = vld [vmem:[#allocation8 + $0x324] ss:$8 sps:$4 sm:$0xff]  }
 0x1e1   :  { %1139 = vmatprep.subr.bf16.mxu1 %v2419_v41  ;;  %v2477_v41 = vld [vmem:[#allocation8 + $0x320] ss:$8 sps:$4 sm:$0xff]  }
 0x1e4   :  { %1140 = vmatpush1.bf16.msra.mxu1 %v2417_v43  ;;  %v2482_v43 = vld [vmem:[#allocation8 + $0x334] ss:$8 sps:$4 sm:$0xff]  }
 0x1e5   :  { %1141 = vmatprep.subr.bf16.mxu1 %v2422_v45  ;;  %v2480_v45 = vld [vmem:[#allocation8 + $0x330] ss:$8 sps:$4 sm:$0xff]  }
 0x1e8   :  { %1142 = vmatpush1.bf16.msra.mxu1 %v2420_v46  ;;  %v2485_v46 = vld [vmem:[#allocation8 + $0x344] ss:$8 sps:$4 sm:$0xff]  }
 0x1e9   :  { %1637 = vmatprep.subr.bf16.mxu1 %v2473_v37  ;;  %v2536_v37 = vld [vmem:[#allocation8 + $0x454] ss:$8 sps:$4 sm:$0xff]  }
 0x27e   :  { %v882_v12 = vpop.f32.mrb[0].mxu1 }
 0x27f   :  { %v883_v13 = vadd.f32 %v882_v12, %v681_v10  ;;  %v884_v14 = vpop.f32.mrb[1].mxu1 }
 0x280   :  { %v885_v15 = vadd.f32 %v884_v14, %v685_v11  ;;  %v886_v16 = vpop.f32.mrb[2].mxu1 }
 0x281   :  { %v895_v17 = vmul.f32 0.1, %v883_v13  ;;  %v887_v18 = vadd.f32 %v886_v16, %v681_v10  ;;  %v888_v19 = vpop.f32.mrb[3].mxu1  ;;  %vm891_vm4 = vcmp.gt.f32.partialorder %v883_v13, 0.0 }
 0x282   :  { %v896_v20 = vmul.f32 0.1, %v885_v15  ;;  %v889_v21 = vadd.f32 %v888_v19, %v685_v11  ;;  %vm892_vm5 = vcmp.gt.f32.partialorder %v885_v15, 0.0 }
 0x283   :  { %vm893_vm6 = vcmp.gt.f32.partialorder %v887_v18, 0.0  ;;  %v897_v22 = vmul.f32 0.1, %v887_v18  ;;  %v899_v24 = vsel %vm891_vm4, %v883_v13, %v895_v17 }
 0x284   :  { %vm894_vm7 = vcmp.gt.f32.partialorder %v889_v21, 0.0  ;;  %v898_v23 = vmul.f32 0.1, %v889_v21  ;;  %v900_v27 = vsel %vm892_vm5, %v885_v15, %v896_v20 }
 0x285   :  { %v901_v25 = vsel %vm893_vm6, %v887_v18, %v897_v22  ;;  %v2510_v22 = vld [vmem:[#allocation8 + $0x3d0] ss:$8 sps:$4 sm:$0xff]  }
 0x286   :  { %v903_v26 = vpack.c.bf16 %v901_v25, %v899_v24  ;;  %v902_v28 = vsel %vm894_vm7, %v889_v21, %v898_v23  ;;  %v2512_v21 = vld [vmem:[#allocation8 + $0x3d4] ss:$8 sps:$4 sm:$0xff]   ;;  %v2515_v23 = vld [vmem:[#allocation8 + $0x3e4] ss:$8 sps:$4 sm:$0xff]   ;;  %v2513_v24 = vld [vmem:[#allocation8 + $0x3e0] ss:$8 sps:$4 sm:$0xff]  }
 0x287   :  { %v904_v29 = vpack.c.bf16 %v902_v28, %v900_v27  ;;  %v2518_v25 = vld [vmem:[#allocation8 + $0x3f4] ss:$8 sps:$4 sm:$0xff]   ;;  %v2519_v27 = vld [vmem:[#allocation8 + $0x400] ss:$8 sps:$4 sm:$0xff]   ;;  %v2521_v28 = vld [vmem:[#allocation8 + $0x404] ss:$8 sps:$4 sm:$0xff]  }
 0x288   :  { %1900 = vmatprep.subr.bf16.mxu0 %v2521_v28 }
 0x289   :  { %1143 = vmatprep.mubr.bf16.mxu1 %v904_v29  ;;  %v2524_v29 = vld [vmem:[#allocation8 + $0x414] ss:$8 sps:$4 sm:$0xff]  }
 0x28a   :  { %1144 = vmatmul.mubr.bf16.vlgmr.msra.gmra.mrb[4].mxu1 %v903_v26  ;;  %v2516_v26 = vld [vmem:[#allocation8 + $0x3f0] ss:$8 sps:$4 sm:$0xff]  }
 0x28b   :  { %1638 = vmatpush1.bf16.msra.mxu1 %v2471_v36  ;;  %v2531_v36 = vld [vmem:[#allocation8 + $0x440] ss:$8 sps:$4 sm:$0xff]  }
 0x28c   :  { %1639 = vmatprep.subr.bf16.mxu1 %v2476_v38  ;;  %v2534_v38 = vld [vmem:[#allocation8 + $0x450] ss:$8 sps:$4 sm:$0xff]  }
 0x28f   :  { %1640 = vmatpush1.bf16.msra.mxu1 %v2474_v39  ;;  %v2539_v39 = vld [vmem:[#allocation8 + $0x464] ss:$8 sps:$4 sm:$0xff]  }
 0x290   :  { %1641 = vmatprep.subr.bf16.mxu1 %v2479_v40  ;;  %v2537_v40 = vld [vmem:[#allocation8 + $0x460] ss:$8 sps:$4 sm:$0xff]  }
 0x293   :  { %1642 = vmatpush1.bf16.msra.mxu1 %v2477_v41  ;;  %v2542_v41 = vld [vmem:[#allocation8 + $0x474] ss:$8 sps:$4 sm:$0xff]  }
 0x294   :  { %1643 = vmatprep.subr.bf16.mxu1 %v2482_v43  ;;  %v2540_v43 = vld [vmem:[#allocation8 + $0x470] ss:$8 sps:$4 sm:$0xff]  }
 0x297   :  { %1644 = vmatpush1.bf16.msra.mxu1 %v2480_v45  ;;  %v2545_v45 = vld [vmem:[#allocation8 + $0x484] ss:$8 sps:$4 sm:$0xff]  }
 0x298   :  { %1645 = vmatprep.subr.bf16.mxu1 %v2485_v46  ;;  %v2543_v46 = vld [vmem:[#allocation8 + $0x480] ss:$8 sps:$4 sm:$0xff]  }
 0x29b   :  { %1646 = vmatpush1.bf16.msra.mxu1 %v2483_v47  ;;  %v2548_v47 = vld [vmem:[#allocation8 + $0x494] ss:$8 sps:$4 sm:$0xff]  }
 0x29c   :  { %1647 = vmatprep.subr.bf16.mxu1 %v2488_v48  ;;  %v2546_v48 = vld [vmem:[#allocation8 + $0x490] ss:$8 sps:$4 sm:$0xff]  }
 0x29f   :  { %1648 = vmatpush1.bf16.msra.mxu1 %v2486_v49  ;;  %v2551_v49 = vld [vmem:[#allocation8 + $0x4a4] ss:$8 sps:$4 sm:$0xff]  }
 0x2a0   :  { %1649 = vmatprep.subr.bf16.mxu1 %v2491_v50  ;;  %v2549_v50 = vld [vmem:[#allocation8 + $0x4a0] ss:$8 sps:$4 sm:$0xff]  }
 0x2a3   :  { %1650 = vmatpush1.bf16.msra.mxu1 %v2489_v51  ;;  %v2554_v51 = vld [vmem:[#allocation8 + $0x4b4] ss:$8 sps:$4 sm:$0xff]  }
 0x2a4   :  { %1651 = vmatprep.subr.bf16.mxu1 %v2494_v52  ;;  %v2552_v52 = vld [vmem:[#allocation8 + $0x4b0] ss:$8 sps:$4 sm:$0xff]  }
 0x2a7   :  { %1652 = vmatpush1.bf16.msra.mxu1 %v2492_v53  ;;  %v2557_v53 = vld [vmem:[#allocation8 + $0x4c4] ss:$8 sps:$4 sm:$0xff]  }
 0x2a8   :  { %1653 = vmatprep.subr.bf16.mxu1 %v2497_v54  ;;  %v2555_v54 = vld [vmem:[#allocation8 + $0x4c0] ss:$8 sps:$4 sm:$0xff]  }
 0x2ab   :  { %1654 = vmatpush1.bf16.msra.mxu1 %v2495_v55  ;;  %v2111_v55 = vld [vmem:[%s2890_s8 + $0x4] sm:$0x3] }
 0x2ac   :  { %1655 = vmatprep.subr.bf16.mxu1 %v2500_v56  ;;  %v1207_v56 = vrot.slane %v2111_v55, %v2831_v42 }
 0x2af   :  { %1656 = vmatpush1.bf16.msra.mxu1 %v2498_v57  ;;  %v1211_v57 = vrot.slane %v2111_v55, %v2836_v44 }
 0x2b0   :  { %1657 = vmatprep.subr.bf16.mxu1 %v2503_v58 }
 0x2b3   :  { %1658 = vmatpush1.bf16.msra.mxu1 %v2501_v59 }
 0x2b4   :  { %1659 = vmatprep.subr.bf16.mxu1 %v2506_v60 }
 0x2b7   :  { %1660 = vmatpush1.bf16.msra.mxu1 %v2504_v61 }
 0x2b8   :  { %1661 = vmatprep.subr.bf16.mxu1 %v2509_v62 }
 0x2bb   :  { %1662 = vmatpush1.bf16.msra.mxu1 %v2507_v63 }
 0x2bc   :  { %1663 = vmatprep.subr.bf16.mxu1 %v2512_v21 }
 0x2bf   :  { %1664 = vmatpush1.bf16.msra.mxu1 %v2510_v22 }
 0x2c0   :  { %1665 = vmatprep.subr.bf16.mxu1 %v2515_v23 }
 0x2c3   :  { %1666 = vmatpush1.bf16.msra.mxu1 %v2513_v24 }
 0x2c4   :  { %1667 = vmatprep.subr.bf16.mxu1 %v2518_v25 }
 0x2c7   :  { %1668 = vmatpush1.bf16.msra.mxu1 %v2516_v26 }
 0x35d   :  { %v1145_v3 = vpop.f32.mrb[4].mxu1 }
 0x35e   :  { %v1146_v4 = vadd.f32 %v1145_v3, %v944_v1  ;;  %v1147_v5 = vpop.f32.mrb[5].mxu1 }
 0x35f   :  { %v1148_v6 = vadd.f32 %v1147_v5, %v948_v2  ;;  %v1149_v7 = vpop.f32.mrb[6].mxu1 }
 0x360   :  { %v1158_v8 = vmul.f32 0.1, %v1146_v4  ;;  %v1150_v9 = vadd.f32 %v1149_v7, %v944_v1  ;;  %v1151_v10 = vpop.f32.mrb[7].mxu1  ;;  %vm1154_vm8 = vcmp.gt.f32.partialorder %v1146_v4, 0.0 }
 0x361   :  { %v1159_v11 = vmul.f32 0.1, %v1148_v6  ;;  %v1152_v12 = vadd.f32 %v1151_v10, %v948_v2  ;;  %vm1155_vm9 = vcmp.gt.f32.partialorder %v1148_v6, 0.0 }
 0x362   :  { %vm1156_vm10 = vcmp.gt.f32.partialorder %v1150_v9, 0.0  ;;  %v1160_v13 = vmul.f32 0.1, %v1150_v9  ;;  %v1162_v15 = vsel %vm1154_vm8, %v1146_v4, %v1158_v8 }
 0x363   :  { %vm1157_vm11 = vcmp.gt.f32.partialorder %v1152_v12, 0.0  ;;  %v1161_v14 = vmul.f32 0.1, %v1152_v12  ;;  %v1163_v18 = vsel %vm1155_vm9, %v1148_v6, %v1159_v11 }
 0x364   :  { %v1164_v16 = vsel %vm1156_vm10, %v1150_v9, %v1160_v13  ;;  %v2558_v13 = vld [vmem:[#allocation8 + $0x4d0] ss:$8 sps:$4 sm:$0xff]  }
 0x365   :  { %v1166_v17 = vpack.c.bf16 %v1164_v16, %v1162_v15  ;;  %v1165_v19 = vsel %vm1157_vm11, %v1152_v12, %v1161_v14  ;;  %v2560_v12 = vld [vmem:[#allocation8 + $0x4d4] ss:$8 sps:$4 sm:$0xff]   ;;  %v2563_v14 = vld [vmem:[#allocation8 + $0x4e4] ss:$8 sps:$4 sm:$0xff]   ;;  %v2561_v15 = vld [vmem:[#allocation8 + $0x4e0] ss:$8 sps:$4 sm:$0xff]  }
 0x366   :  { %v1167_v20 = vpack.c.bf16 %v1165_v19, %v1163_v18  ;;  %v2566_v16 = vld [vmem:[#allocation8 + $0x4f4] ss:$8 sps:$4 sm:$0xff]  }
 0x367   :  { %v2144_v18 = vld [vmem:[%s2890_s8 + $0x6] sm:$0x3] }
 0x368   :  { %1406 = vmatprep.mubr.bf16.mxu0 %v1167_v20  ;;  %v1470_v19 = vrot.slane %v2144_v18, %v2831_v42  ;;  %v1474_v20 = vrot.slane %v2144_v18, %v2836_v44 }
 0x369   :  { %1407 = vmatmul.mubr.bf16.vlgmr.msra.gmra.mrb[4].mxu0 %v1166_v17  ;;  %v2564_v17 = vld [vmem:[#allocation8 + $0x4f0] ss:$8 sps:$4 sm:$0xff]  }
 0x36a   :  { %1901 = vmatpush1.bf16.msra.mxu0 %v2519_v27 }
 0x36b   :  { %1902 = vmatprep.subr.bf16.mxu0 %v2524_v29 }
 0x36e   :  { %1903 = vmatpush1.bf16.msra.mxu0 %v2522_v30 }
 0x36f   :  { %1904 = vmatprep.subr.bf16.mxu0 %v2527_v31 }
 0x372   :  { %1905 = vmatpush1.bf16.msra.mxu0 %v2525_v32 }
 0x373   :  { %1906 = vmatprep.subr.bf16.mxu0 %v2530_v33 }
 0x376   :  { %1907 = vmatpush1.bf16.msra.mxu0 %v2528_v34 }
 0x377   :  { %1908 = vmatprep.subr.bf16.mxu0 %v2533_v35 }
 0x37a   :  { %1909 = vmatpush1.bf16.msra.mxu0 %v2531_v36 }
 0x37b   :  { %1910 = vmatprep.subr.bf16.mxu0 %v2536_v37 }
 0x37e   :  { %1911 = vmatpush1.bf16.msra.mxu0 %v2534_v38 }
 0x37f   :  { %1912 = vmatprep.subr.bf16.mxu0 %v2539_v39  ;;  %v2177_v39 = vld [vmem:[%s2890_s8 + $0x8] sm:$0x3]  ;;  %s2655_s8 = scalar_lea.vmem %s1965_s13, 512 }
 0x380   :  { %p2656_p4 = scmp.ne.s32.totalorder %s1965_s13, %s2655_s8  ;;  %p2661_p6 = scmp.lt.s32.totalorder %s2655_s8, %s2655_s8 }
 0x382   :  { %1913 = vmatpush1.bf16.msra.mxu0 %v2537_v40  ;;  %v1733_v40 = vrot.slane %v2177_v39, %v2831_v42  ;;  %p2662_p7 = por %p2661_p6, %p2660_p5 }
 0x383   :  { %1914 = vmatprep.subr.bf16.mxu0 %v2542_v41  ;;  %v1737_v41 = vrot.slane %v2177_v39, %v2836_v44 }
 0x384   :  { %p2663_p8 = pnand %p2662_p7, %p2656_p4 }
 0x386   :  { %1915 = vmatpush1.bf16.msra.mxu0 %v2540_v43 }
 0x387   :  { %1916 = vmatprep.subr.bf16.mxu0 %v2545_v45 }
 0x38a   :  { %1917 = vmatpush1.bf16.msra.mxu0 %v2543_v46 }
 0x38b   :  { %1918 = vmatprep.subr.bf16.mxu0 %v2548_v47 }
 0x38e   :  { %1919 = vmatpush1.bf16.msra.mxu0 %v2546_v48 }
 0x38f   :  { %1920 = vmatprep.subr.bf16.mxu0 %v2551_v49 }
 0x392   :  { %1921 = vmatpush1.bf16.msra.mxu0 %v2549_v50 }
 0x393   :  { %1922 = vmatprep.subr.bf16.mxu0 %v2554_v51 }
 0x396   :  { %1923 = vmatpush1.bf16.msra.mxu0 %v2552_v52 }
 0x397   :  { %1924 = vmatprep.subr.bf16.mxu0 %v2557_v53 }
 0x39a   :  { %1925 = vmatpush1.bf16.msra.mxu0 %v2555_v54 }
 0x39b   :  { %1926 = vmatprep.subr.bf16.mxu0 %v2560_v12 }
 0x39e   :  { %1927 = vmatpush1.bf16.msra.mxu0 %v2558_v13 }
 0x39f   :  { %1928 = vmatprep.subr.bf16.mxu0 %v2563_v14 }
 0x3a2   :  { %1929 = vmatpush1.bf16.msra.mxu0 %v2561_v15 }
 0x3a3   :  { %1930 = vmatprep.subr.bf16.mxu0 %v2566_v16 }
 0x3a6   :  { %1931 = vmatpush1.bf16.msra.mxu0 %v2564_v17 }
 0x43c   :  { %v1408_v58 = vpop.f32.mrb[4].mxu0 }
 0x43d   :  { %v1409_v59 = vadd.f32 %v1408_v58, %v1207_v56  ;;  %v1410_v60 = vpop.f32.mrb[5].mxu0 }
 0x43e   :  { %v1411_v61 = vadd.f32 %v1410_v60, %v1211_v57  ;;  %v1412_v62 = vpop.f32.mrb[6].mxu0 }
 0x43f   :  { %v1421_v63 = vmul.f32 0.1, %v1409_v59  ;;  %v1413_v0 = vadd.f32 %v1412_v62, %v1207_v56  ;;  %v1414_v1 = vpop.f32.mrb[7].mxu0  ;;  %vm1417_vm12 = vcmp.gt.f32.partialorder %v1409_v59, 0.0 }
 0x440   :  { %v1422_v2 = vmul.f32 0.1, %v1411_v61  ;;  %v1415_v3 = vadd.f32 %v1414_v1, %v1211_v57  ;;  %vm1418_vm13 = vcmp.gt.f32.partialorder %v1411_v61, 0.0 }
 0x441   :  { %vm1419_vm14 = vcmp.gt.f32.partialorder %v1413_v0, 0.0  ;;  %v1423_v4 = vmul.f32 0.1, %v1413_v0  ;;  %v1425_v6 = vsel %vm1417_vm12, %v1409_v59, %v1421_v63 }
 0x442   :  { %vm1420_vm15 = vcmp.gt.f32.partialorder %v1415_v3, 0.0  ;;  %v1424_v5 = vmul.f32 0.1, %v1415_v3  ;;  %v1426_v9 = vsel %vm1418_vm13, %v1411_v61, %v1422_v2 }
 0x443   :  { %v1427_v7 = vsel %vm1419_vm14, %v1413_v0, %v1423_v4 }
 0x444   :  { %v1429_v8 = vpack.c.bf16 %v1427_v7, %v1425_v6  ;;  %v1428_v10 = vsel %vm1420_vm15, %v1415_v3, %v1424_v5 }
 0x445   :  { %v1430_v11 = vpack.c.bf16 %v1428_v10, %v1426_v9 }
 0x447   :  { %1669 = vmatprep.mubr.bf16.mxu1 %v1430_v11 }
 0x448   :  { %1670 = vmatmul.mubr.bf16.vlgmr.msra.gmra.mrb[8].mxu1 %v1429_v8 }
 0x51b   :  { %v1671_v21 = vpop.f32.mrb[8].mxu1 }
 0x51c   :  { %v1672_v22 = vadd.f32 %v1671_v21, %v1470_v19  ;;  %v1673_v23 = vpop.f32.mrb[9].mxu1 }
 0x51d   :  { %v1674_v24 = vadd.f32 %v1673_v23, %v1474_v20  ;;  %v1675_v25 = vpop.f32.mrb[10].mxu1 }
 0x51e   :  { %v1684_v26 = vmul.f32 0.1, %v1672_v22  ;;  %v1676_v27 = vadd.f32 %v1675_v25, %v1470_v19  ;;  %v1677_v28 = vpop.f32.mrb[11].mxu1  ;;  %vm1680_vm0 = vcmp.gt.f32.partialorder %v1672_v22, 0.0 }
 0x51f   :  { %v1685_v29 = vmul.f32 0.1, %v1674_v24  ;;  %v1678_v30 = vadd.f32 %v1677_v28, %v1474_v20  ;;  %vm1681_vm1 = vcmp.gt.f32.partialorder %v1674_v24, 0.0 }
 0x520   :  { %vm1682_vm2 = vcmp.gt.f32.partialorder %v1676_v27, 0.0  ;;  %v1686_v31 = vmul.f32 0.1, %v1676_v27  ;;  %v1688_v33 = vsel %vm1680_vm0, %v1672_v22, %v1684_v26 }
 0x521   :  { %vm1683_vm3 = vcmp.gt.f32.partialorder %v1678_v30, 0.0  ;;  %v1687_v32 = vmul.f32 0.1, %v1678_v30  ;;  %v1689_v36 = vsel %vm1681_vm1, %v1674_v24, %v1685_v29 }
 0x522   :  { %v1690_v34 = vsel %vm1682_vm2, %v1676_v27, %v1686_v31 }
 0x523   :  { %v1692_v35 = vpack.c.bf16 %v1690_v34, %v1688_v33  ;;  %v1691_v37 = vsel %vm1683_vm3, %v1678_v30, %v1687_v32 }
 0x524   :  { %v1693_v38 = vpack.c.bf16 %v1691_v37, %v1689_v36 }
 0x526   :  { %1932 = vmatprep.mubr.bf16.mxu0 %v1693_v38 }
 0x527   :  { %1933 = vmatmul.mubr.bf16.vlgmr.msra.gmra.mrb[8].mxu0 %v1692_v35 }
 0x5fa   :  { %v1934_v43 = vpop.f32.mrb[8].mxu0 }
 0x5fb   :  { %v1935_v45 = vadd.f32 %v1934_v43, %v1733_v40  ;;  %v1936_v46 = vpop.f32.mrb[9].mxu0 }
 0x5fc   :  { %v1937_v47 = vadd.f32 %v1936_v46, %v1737_v41  ;;  %v1938_v48 = vpop.f32.mrb[10].mxu0 }
 0x5fd   :  { %vm1943_vm4 = vcmp.gt.f32.partialorder %v1935_v45, 0.0  ;;  %v1947_v49 = vmul.f32 0.1, %v1935_v45  ;;  %v1939_v50 = vadd.f32 %v1938_v48, %v1733_v40  ;;  %v1940_v51 = vpop.f32.mrb[11].mxu0 }
 0x5fe   :  { %vm1944_vm5 = vcmp.gt.f32.partialorder %v1937_v47, 0.0  ;;  %v1948_v52 = vmul.f32 0.1, %v1937_v47  ;;  %v1941_v53 = vadd.f32 %v1940_v51, %v1737_v41 }
 0x5ff   :  { %v1951_v54 = vsel %vm1943_vm4, %v1935_v45, %v1947_v49  ;;  %vm1945_vm6 = vcmp.gt.f32.partialorder %v1939_v50, 0.0  ;;  %v1949_v55 = vmul.f32 0.1, %v1939_v50 }
 0x600   :  { %1955 = vst [vmem:[#allocation10] sm:$0xff] %v1951_v54  ;;  %v1952_v42 = vsel %vm1944_vm5, %v1937_v47, %v1948_v52  ;;  %vm1946_vm7 = vcmp.gt.f32.partialorder %v1941_v53, 0.0  ;;  %v1950_v44 = vmul.f32 0.1, %v1941_v53 }
 0x601   :  { %1956 = vst [vmem:[#allocation10 + $0x8] sm:$0xff] %v1952_v42  ;;  %v1953_v56 = vsel %vm1945_vm6, %v1939_v50, %v1949_v55 }
 0x602   :  { %1957 = vst [vmem:[#allocation10 + $0x10] sm:$0xff] %v1953_v56  ;;  %v1954_v57 = vsel %vm1946_vm7, %v1941_v53, %v1950_v44 }
 0x603   :  { %1958 = vst [vmem:[#allocation10 + $0x18] sm:$0xff] %v1954_v57 }
 0x604   :  { %2666 = shalt.err (!%p2663_p8)
}
 0x605   :  { %s2667_s14 = scalar_lea.hbm %s2891_s9, 512 }
 0x606   :  { %p2668_p9 = scmp.ne.s32.totalorder %s2891_s9, %s2667_s14  ;;  %p2671_p10 = scmp.lt.u32.totalorder %s2667_s14, %s2891_s9 }
 0x608   :  { %p2673_p11 = pnand %p2671_p10, %p2668_p9 }
 0x60a   :  { %2676 = shalt.err (!%p2673_p11)
}
 0x60b   :  { %s2693_s22 = smov 256   ;;  %s2694_s16 = smov 16  }
 0x60c   :  { %1970 = dma.vmem_to_hbm [thread:$0]  %s1965_s13, 512, %s2891_s9, [#allocation4], %s2693_s22, %s2693_s22, %s2694_s16  }
 0x60d   :  { %2683 = dma.done.wait [#allocation4], 512  }
 0x60e   :  { %2684 = vsyncadd [#allocation4], 4294966784 }
 0x60f   :  { %1974 = vsyncpa [#allocation3], 1 }
 0x610   :  { %1975 = vsyncpa [#allocation6], 1 }
 0x611   :  { %1976 = vsyncpa [#allocation9], 1 }
 0x612   :  { %1977 = vsyncpa [#allocation4], 1 }

</bundles_post_ra>
